<compile_context>
chip_gen: v5e
topology: v5e:2x2
jax: 0.10.0
libtpu: 0.0.40
codegen_flags: <defaults>
</compile_context>

<pallas_src>
import jax
import jax.numpy as jnp
from jax.experimental import pallas as pl
from jax.experimental.pallas import tpu as pltpu


def _se_mul_conv1x1_kernel(w_ref, gate_ref, x_ref, o_ref):
    # w_ref:    (Cout_blk, Cin)   1x1 conv weight block, natural layout
    # gate_ref: (1, 1, Cin)       per-channel gate logits (pre-sigmoid), this batch
    # x_ref:    (1, Cin, M)       activations, this batch (M = H*W) -- NOT upcast
    # o_ref:    (1, Cout_blk, M)
    gate = jax.nn.sigmoid(gate_ref[0].astype(jnp.float32))      # (1, Cin), EUP, f32
    # Fold gate into the small operand, then drop to the activation dtype so
    # the MXU consumes its native input dtype; accumulate in f32.
    w_gated = (w_ref[...] * gate).astype(x_ref.dtype)           # (Cout_blk, Cin)
    o_ref[0] = jnp.dot(
        w_gated,
        x_ref[0],
        preferred_element_type=jnp.float32,
    ).astype(o_ref.dtype)


def se_mul_conv1x1(x_nchw, gate_nchw, weight_oihw, *, cout_split=1):
    """x_nchw: (N, Cin, H, W); gate_nchw: (N, Cin, 1, 1); weight: (Cout, Cin, 1, 1).

    cout_split: set to 2 on v7x to use both TensorCores when N == 1.
    """
    n, cin, h, w = x_nchw.shape
    cout = weight_oihw.shape[0]
    hw = h * w
    assert cout % cout_split == 0
    cout_blk = cout // cout_split

    # Contiguous (free) reshapes only -- no transposes.
    x3d = x_nchw.reshape(n, cin, hw)        # (N, Cin, H*W)
    gate3d = gate_nchw.reshape(n, 1, cin)   # (N, 1, Cin)
    w2d = weight_oihw.reshape(cout, cin)    # (Cout, Cin)

    def _nbytes(shape, dtype):
        sz = 1
        for s in shape:
            sz *= s
        return sz * jnp.dtype(dtype).itemsize

    cost = pl.CostEstimate(
        flops=2 * n * hw * cin * cout,
        transcendentals=n * cin,
        bytes_accessed=(
            _nbytes(x3d.shape, x3d.dtype)
            + _nbytes(gate3d.shape, gate3d.dtype)
            + _nbytes(w2d.shape, w2d.dtype)
            + _nbytes((n, cout, hw), x_nchw.dtype)
        ),
    )

    out3d = pl.pallas_call(
        _se_mul_conv1x1_kernel,
        out_shape=jax.ShapeDtypeStruct((n, cout, hw), x_nchw.dtype),
        grid_spec=pltpu.PrefetchScalarGridSpec(
            num_scalar_prefetch=0,
            grid=(n, cout_split),
            in_specs=[
                pl.BlockSpec((cout_blk, cin), lambda b, c: (c, 0)),      # weight block
                pl.BlockSpec((1, 1, cin), lambda b, c: (b, 0, 0)),       # gate, per batch
                pl.BlockSpec((1, cin, hw), lambda b, c: (b, 0, 0)),      # activations
            ],
            out_specs=pl.BlockSpec((1, cout_blk, hw), lambda b, c: (b, c, 0)),
        ),
        compiler_params=pltpu.CompilerParams(
            dimension_semantics=("parallel", "parallel"),
        ),
        cost_estimate=cost,
    )(w2d, gate3d, x3d)

    # (N, Cout, H*W) -> (N, Cout, H, W): free contiguous reshape.
    return out3d.reshape(n, cout, h, w)


if __name__ == "__main__":
    key = jax.random.PRNGKey(0)
    k1, k2, k3 = jax.random.split(key, 3)

    # Shapes implied by the module: x195 (1,672,14,14), x199 (1,672,1,1), conv 672->112.
    N, CIN, H, W, COUT = 1, 672, 14, 14, 112
    x195 = jax.random.normal(k1, (N, CIN, H, W), dtype=jnp.float32)
    x199 = jax.random.normal(k2, (N, CIN, 1, 1), dtype=jnp.float32)
    weight = jax.random.normal(k3, (COUT, CIN, 1, 1), dtype=jnp.float32) * (1.0 / CIN) ** 0.5

    # Pure-JAX reference of the fused op (sigmoid gate * x, then 1x1 conv), f32.
    ref = jnp.einsum(
        "nchw,oc->nohw",
        x195 * jax.nn.sigmoid(x199),
        weight.reshape(COUT, CIN),
    )

    # 1) f32 path -- matches the PyTorch module's semantics exactly.
    out = se_mul_conv1x1(x195, x199, weight)
    out = jax.block_until_ready(out)
    assert out.shape == (N, COUT, H, W)
    assert jnp.allclose(out, ref, atol=1e-4, rtol=1e-4)

    # 2) bf16-I/O path (recommended deployment dtype): X stays bf16 into the MXU,
    #    f32 accumulation. Loosened tolerance vs. the f32 reference.
    out_bf16 = se_mul_conv1x1(
        x195.astype(jnp.bfloat16), x199.astype(jnp.bfloat16), weight.astype(jnp.bfloat16)
    )
    out_bf16 = jax.block_until_ready(out_bf16)
    assert out_bf16.shape == (N, COUT, H, W)
    assert float(jnp.max(jnp.abs(out_bf16.astype(jnp.float32) - ref))) < 1e-1

    print("KERNEL_OK")
</pallas_src>

<mosaic_0001>
module attributes {stable_mosaic.version = 11 : i64} {
  func.func @_se_mul_conv1x1_kernel(%arg0: i32, %arg1: i32, %arg2: memref<112x672xf32, #tpu.memory_space<vmem>>, %arg3: memref<1x1x672xf32, #tpu.memory_space<vmem>>, %arg4: memref<1x672x196xf32, #tpu.memory_space<vmem>>, %arg5: memref<1x112x196xf32, #tpu.memory_space<vmem>>) attributes {dimension_semantics = [#tpu.dimension_semantics<parallel>, #tpu.dimension_semantics<parallel>], iteration_bounds = array<i64: 1, 1>, scalar_prefetch = 0 : i64, scratch_operands = 0 : i64, tpu.core_type = #tpu.core_type<tc>, window_params = [{transform_indices = @transform_0, window_bounds = array<i64: 112, 672>}, {transform_indices = @transform_1, window_bounds = array<i64: 1, 1, 672>}, {transform_indices = @transform_2, window_bounds = array<i64: 1, 672, 196>}, {transform_indices = @transform_3, window_bounds = array<i64: 1, 112, 196>}]} {
    %c0 = arith.constant 0 : index
    %c0_0 = arith.constant 0 : index
    %c0_1 = arith.constant 0 : index
    %0 = vector.load %arg3[%c0, %c0_0, %c0_1] : memref<1x1x672xf32, #tpu.memory_space<vmem>>, vector<1x1x672xf32>
    %1 = vector.shape_cast %0 : vector<1x1x672xf32> to vector<1x672xf32>
    %2 = arith.negf %1 : vector<1x672xf32>
    %3 = math.exp %2 : vector<1x672xf32>
    %cst = arith.constant 1.000000e+00 : f32
    %4 = vector.broadcast %cst : f32 to vector<1x672xf32>
    %5 = arith.addf %4, %3 : vector<1x672xf32>
    %6 = arith.divf %4, %5 : vector<1x672xf32>
    %c0_2 = arith.constant 0 : index
    %c0_3 = arith.constant 0 : index
    %7 = vector.load %arg2[%c0_2, %c0_3] : memref<112x672xf32, #tpu.memory_space<vmem>>, vector<112x672xf32>
    %8 = vector.broadcast %6 : vector<1x672xf32> to vector<112x672xf32>
    %9 = arith.mulf %7, %8 : vector<112x672xf32>
    %c0_4 = arith.constant 0 : index
    %c0_5 = arith.constant 0 : index
    %c0_6 = arith.constant 0 : index
    %10 = vector.load %arg4[%c0_4, %c0_5, %c0_6] : memref<1x672x196xf32, #tpu.memory_space<vmem>>, vector<1x672x196xf32>
    %11 = vector.shape_cast %10 : vector<1x672x196xf32> to vector<672x196xf32>
    %cst_7 = arith.constant dense<0.000000e+00> : vector<112x196xf32>
    %12 = tpu.matmul %9, %11, %cst_7 {dimension_numbers = #tpu.dot_dimension_numbers<[1], [0], [0], [1], [0, 0, 1, 1], [], []>} : vector<112x672xf32>, vector<672x196xf32>, vector<112x196xf32> -> vector<112x196xf32>
    %c0_8 = arith.constant 0 : index
    %c0_9 = arith.constant 0 : index
    %c0_10 = arith.constant 0 : index
    %13 = vector.load %arg5[%c0_8, %c0_9, %c0_10] : memref<1x112x196xf32, #tpu.memory_space<vmem>>, vector<1x112x196xf32>
    %14 = vector.shape_cast %13 : vector<1x112x196xf32> to vector<112x196xf32>
    %15 = vector.shape_cast %12 : vector<112x196xf32> to vector<1x112x196xf32>
    tpu.vector_store %arg5[%c0_8, %c0_9, %c0_10], %15 {strides = array<i32>} : memref<1x112x196xf32, #tpu.memory_space<vmem>>, vector<1x112x196xf32>,
    return
  }
  func.func @transform_0(%arg0: i32, %arg1: i32) -> (i32, i32) {
    %c0_i32 = arith.constant 0 : i32
    %c0_i32_0 = arith.constant 0 : i32
    return %arg1, %c0_i32 : i32, i32
  }
  func.func @transform_1(%arg0: i32, %arg1: i32) -> (i32, i32, i32) {
    %c0_i32 = arith.constant 0 : i32
    %c0_i32_0 = arith.constant 0 : i32
    %c0_i32_1 = arith.constant 0 : i32
    return %arg0, %c0_i32, %c0_i32_0 : i32, i32, i32
  }
  func.func @transform_2(%arg0: i32, %arg1: i32) -> (i32, i32, i32) {
    %c0_i32 = arith.constant 0 : i32
    %c0_i32_0 = arith.constant 0 : i32
    %c0_i32_1 = arith.constant 0 : i32
    return %arg0, %c0_i32, %c0_i32_0 : i32, i32, i32
  }
  func.func @transform_3(%arg0: i32, %arg1: i32) -> (i32, i32, i32) {
    %c0_i32 = arith.constant 0 : i32
    %c0_i32_0 = arith.constant 0 : i32
    return %arg0, %arg1, %c0_i32 : i32, i32, i32
  }
}

</mosaic_0001>

<bundles_post_ra>
// kernel: tpu_custom_call.1
= control target key start
LH: loop header
LB: loop body
LE: loop exit
PB: predicated region body
PF: predicated region fallthrough
CT: control target
= control target key end

     0   :  { %vm383_vm4 = vcmask 261120   ;;  %vm1135_vm5 = vcmask 556032   ;;  %s2629_s2 = inlined_call_operand.vmem [shape: f32[1,672,196], index: 2, kind: input, shape index: {}]   ;;  %s2630_s1 = inlined_call_operand.vmem [shape: f32[1,1,672], index: 1, kind: input, shape index: {}]   ;;  %s2631_s0 = inlined_call_operand.vmem [shape: f32[112,672], index: 0, kind: input, shape index: {}]   ;;  %s2632_s3 = inlined_call_operand.vmem [shape: f32[1,112,196], index: 3, kind: output, shape index: {}]  }
   0x1   :  { %v245_v0 = vld [vmem:[%s2629_s2 + $0xf0] sm:$0xff]  ;;  %v243_v3 = vld [vmem:[%s2629_s2 + $0xe0] sm:$0xff] }
   0x2   :  { %v309_v1 = vld [vmem:[%s2629_s2 + $0x2f0] sm:$0xff]  ;;  %426 = vmatpush.msra.mxu0 %v245_v0  ;;  %v307_v5 = vld [vmem:[%s2629_s2 + $0x2e0] sm:$0xff] }
   0x3   :  { %v341_v2 = vld [vmem:[%s2629_s2 + $0x3f0] sm:$0xff]  ;;  %544 = vmatpush.msra.mxu2 %v309_v1  ;;  %v339_v6 = vld [vmem:[%s2629_s2 + $0x3e0] sm:$0xff]  ;;  %v246_v1 = vld [vmem:[%s2629_s2 + $0xf8] sm:$0xff] }
   0x4   :  { %v277_v4 = vld [vmem:[%s2629_s2 + $0x1f0] sm:$0xff]  ;;  %603 = vmatpush.msra.mxu3 %v341_v2  ;;  %v275_v8 = vld [vmem:[%s2629_s2 + $0x1e0] sm:$0xff]  ;;  %427 = vmatpush.msra.mxu0 %v243_v3 }
   0x5   :  { %485 = vmatpush.msra.mxu1 %v277_v4  ;;  %v241_v7 = vld [vmem:[%s2629_s2 + $0xd0] sm:$0xff]  ;;  %545 = vmatpush.msra.mxu2 %v307_v5  ;;  %v239_v11 = vld [vmem:[%s2629_s2 + $0xc0] sm:$0xff] }
   0x6   :  { %v305_v9 = vld [vmem:[%s2629_s2 + $0x2d0] sm:$0xff]  ;;  %604 = vmatpush.msra.mxu3 %v339_v6  ;;  %v303_v13 = vld [vmem:[%s2629_s2 + $0x2c0] sm:$0xff]  ;;  %428 = vmatpush.msra.mxu0 %v241_v7  ;;  %v278_v6 = vld [vmem:[%s2629_s2 + $0x1f8] sm:$0xff] }
   0x7   :  { %v337_v10 = vld [vmem:[%s2629_s2 + $0x3d0] sm:$0xff]  ;;  %486 = vmatpush.msra.mxu1 %v275_v8  ;;  %546 = vmatpush.msra.mxu2 %v305_v9  ;;  %v335_v14 = vld [vmem:[%s2629_s2 + $0x3c0] sm:$0xff]  ;;  %v244_v8 = vld [vmem:[%s2629_s2 + $0xe8] sm:$0xff] }
   0x8   :  { %v273_v12 = vld [vmem:[%s2629_s2 + $0x1d0] sm:$0xff]  ;;  %v271_v15 = vld [vmem:[%s2629_s2 + $0x1c0] sm:$0xff]  ;;  %605 = vmatpush.msra.mxu3 %v337_v10  ;;  %429 = vmatpush.msra.mxu0 %v239_v11  ;;  %v276_v10 = vld [vmem:[%s2629_s2 + $0x1e8] sm:$0xff] }
   0x9   :  { %487 = vmatpush.msra.mxu1 %v273_v12  ;;  %v237_v16 = vld [vmem:[%s2629_s2 + $0xb0] sm:$0xff]  ;;  %547 = vmatpush.msra.mxu2 %v303_v13  ;;  %v235_v20 = vld [vmem:[%s2629_s2 + $0xa0] sm:$0xff]  ;;  %v242_v11 = vld [vmem:[%s2629_s2 + $0xd8] sm:$0xff] }
   0xa   :  { %v301_v17 = vld [vmem:[%s2629_s2 + $0x2b0] sm:$0xff]  ;;  %606 = vmatpush.msra.mxu3 %v335_v14  ;;  %v299_v21 = vld [vmem:[%s2629_s2 + $0x2a0] sm:$0xff]  ;;  %430 = vmatpush.msra.mxu0 %v237_v16  ;;  %v274_v14 = vld [vmem:[%s2629_s2 + $0x1d8] sm:$0xff] }
   0xb   :  { %v333_v18 = vld [vmem:[%s2629_s2 + $0x3b0] sm:$0xff]  ;;  %488 = vmatpush.msra.mxu1 %v271_v15  ;;  %548 = vmatpush.msra.mxu2 %v301_v17  ;;  %v331_v22 = vld [vmem:[%s2629_s2 + $0x3a0] sm:$0xff]  ;;  %v240_v15 = vld [vmem:[%s2629_s2 + $0xc8] sm:$0xff] }
   0xc   :  { %v269_v19 = vld [vmem:[%s2629_s2 + $0x1b0] sm:$0xff]  ;;  %v267_v23 = vld [vmem:[%s2629_s2 + $0x1a0] sm:$0xff]  ;;  %607 = vmatpush.msra.mxu3 %v333_v18  ;;  %431 = vmatpush.msra.mxu0 %v235_v20  ;;  %v272_v18 = vld [vmem:[%s2629_s2 + $0x1c8] sm:$0xff] }
   0xd   :  { %489 = vmatpush.msra.mxu1 %v269_v19  ;;  %v233_v24 = vld [vmem:[%s2629_s2 + $0x90] sm:$0xff]  ;;  %549 = vmatpush.msra.mxu2 %v299_v21  ;;  %v231_v28 = vld [vmem:[%s2629_s2 + $0x80] sm:$0xff] }
   0xe   :  { %v297_v25 = vld [vmem:[%s2629_s2 + $0x290] sm:$0xff]  ;;  %608 = vmatpush.msra.mxu3 %v331_v22  ;;  %v295_v29 = vld [vmem:[%s2629_s2 + $0x280] sm:$0xff]  ;;  %432 = vmatpush.msra.mxu0 %v233_v24 }
   0xf   :  { %v329_v26 = vld [vmem:[%s2629_s2 + $0x390] sm:$0xff]  ;;  %490 = vmatpush.msra.mxu1 %v267_v23  ;;  %550 = vmatpush.msra.mxu2 %v297_v25  ;;  %v327_v30 = vld [vmem:[%s2629_s2 + $0x380] sm:$0xff]  ;;  %v238_v25 = vld [vmem:[%s2629_s2 + $0xb8] sm:$0xff] }
  0x10   :  { %v265_v27 = vld [vmem:[%s2629_s2 + $0x190] sm:$0xff]  ;;  %v263_v31 = vld [vmem:[%s2629_s2 + $0x180] sm:$0xff]  ;;  %609 = vmatpush.msra.mxu3 %v329_v26  ;;  %433 = vmatpush.msra.mxu0 %v231_v28 }
  0x11   :  { %491 = vmatpush.msra.mxu1 %v265_v27  ;;  %v229_v32 = vld [vmem:[%s2629_s2 + $0x70] sm:$0xff]  ;;  %551 = vmatpush.msra.mxu2 %v295_v29  ;;  %v227_v36 = vld [vmem:[%s2629_s2 + $0x60] sm:$0xff]  ;;  %v270_v27 = vld [vmem:[%s2629_s2 + $0x1b8] sm:$0xff] }
  0x12   :  { %v293_v33 = vld [vmem:[%s2629_s2 + $0x270] sm:$0xff]  ;;  %610 = vmatpush.msra.mxu3 %v327_v30  ;;  %v291_v37 = vld [vmem:[%s2629_s2 + $0x260] sm:$0xff]  ;;  %434 = vmatpush.msra.mxu0 %v229_v32  ;;  %v37_v32 = vld [vmem:[%s2631_s0 + $0x18] sm:$0xff] }
  0x13   :  { %v325_v34 = vld [vmem:[%s2629_s2 + $0x370] sm:$0xff]  ;;  %492 = vmatpush.msra.mxu1 %v263_v31  ;;  %552 = vmatpush.msra.mxu2 %v293_v33  ;;  %v323_v38 = vld [vmem:[%s2629_s2 + $0x360] sm:$0xff]  ;;  %v35_v33 = vld [vmem:[%s2631_s0 + $0x8] sm:$0xff] }
  0x14   :  { %v261_v35 = vld [vmem:[%s2629_s2 + $0x170] sm:$0xff]  ;;  %v259_v39 = vld [vmem:[%s2629_s2 + $0x160] sm:$0xff]  ;;  %611 = vmatpush.msra.mxu3 %v325_v34  ;;  %435 = vmatpush.msra.mxu0 %v227_v36 }
  0x15   :  { %493 = vmatpush.msra.mxu1 %v261_v35  ;;  %v225_v40 = vld [vmem:[%s2629_s2 + $0x50] sm:$0xff]  ;;  %553 = vmatpush.msra.mxu2 %v291_v37  ;;  %v223_v44 = vld [vmem:[%s2629_s2 + $0x40] sm:$0xff] }
  0x16   :  { %v289_v41 = vld [vmem:[%s2629_s2 + $0x250] sm:$0xff]  ;;  %612 = vmatpush.msra.mxu3 %v323_v38  ;;  %v287_v45 = vld [vmem:[%s2629_s2 + $0x240] sm:$0xff]  ;;  %436 = vmatpush.msra.mxu0 %v225_v40 }
  0x17   :  { %v321_v42 = vld [vmem:[%s2629_s2 + $0x350] sm:$0xff]  ;;  %494 = vmatpush.msra.mxu1 %v259_v39  ;;  %554 = vmatpush.msra.mxu2 %v289_v41  ;;  %v319_v46 = vld [vmem:[%s2629_s2 + $0x340] sm:$0xff] }
  0x18   :  { %v257_v43 = vld [vmem:[%s2629_s2 + $0x150] sm:$0xff]  ;;  %v255_v47 = vld [vmem:[%s2629_s2 + $0x140] sm:$0xff]  ;;  %613 = vmatpush.msra.mxu3 %v321_v42  ;;  %437 = vmatpush.msra.mxu0 %v223_v44 }
  0x19   :  { %v14_v48 = vld [vmem:[%s2630_s1] sm:$0x3f]  ;;  %495 = vmatpush.msra.mxu1 %v257_v43  ;;  %v221_v49 = vld [vmem:[%s2629_s2 + $0x30] sm:$0xff]  ;;  %555 = vmatpush.msra.mxu2 %v287_v45  ;;  %v236_v45 = vld [vmem:[%s2629_s2 + $0xa8] sm:$0xff] }
  0x1a   :  { %v285_v50 = vld [vmem:[%s2629_s2 + $0x230] sm:$0xff]  ;;  %v1167_v51 = vmul.f32 -1.442695, %v14_v48  ;;  %614 = vmatpush.msra.mxu3 %v319_v46  ;;  %v219_v54 = vld [vmem:[%s2629_s2 + $0x20] sm:$0xff]  ;;  %438 = vmatpush.msra.mxu0 %v221_v49  ;;  %v41_v48 = vld [vmem:[%s2631_s0 + $0x38] sm:$0xff] }
  0x1b   :  { %v317_v52 = vld [vmem:[%s2629_s2 + $0x330] sm:$0xff]  ;;  %496 = vmatpush.msra.mxu1 %v255_v47  ;;  %v283_v55 = vld [vmem:[%s2629_s2 + $0x220] sm:$0xff]  ;;  %556 = vmatpush.msra.mxu2 %v285_v50  ;;  %v43_v47 = vld [vmem:[%s2631_s0 + $0x48] sm:$0xff] }
  0x1c   :  { %v253_v53 = vld [vmem:[%s2629_s2 + $0x130] sm:$0xff]  ;;  %1196 = vpow2.f32 %v1167_v51  ;;  %v315_v56 = vld [vmem:[%s2629_s2 + $0x320] sm:$0xff]  ;;  %615 = vmatpush.msra.mxu3 %v317_v52  ;;  %439 = vmatpush.msra.mxu0 %v219_v54  ;;  %v268_v49 = vld [vmem:[%s2629_s2 + $0x1a8] sm:$0xff] }
  0x1d   :  { %v251_v57 = vld [vmem:[%s2629_s2 + $0x120] sm:$0xff]  ;;  %497 = vmatpush.msra.mxu1 %v253_v53  ;;  %v217_v58 = vld [vmem:[%s2629_s2 + $0x10] sm:$0xff]  ;;  %557 = vmatpush.msra.mxu2 %v283_v55 }
  0x1e   :  { %v281_v59 = vld [vmem:[%s2629_s2 + $0x210] sm:$0xff]  ;;  %616 = vmatpush.msra.mxu3 %v315_v56  ;;  %v215_v62 = vld [vmem:[%s2629_s2] sm:$0xff]  ;;  %440 = vmatpush.msra.mxu0 %v217_v58  ;;  %v234_v56 = vld [vmem:[%s2629_s2 + $0x98] sm:$0xff] }
  0x1f   :  { %v313_v60 = vld [vmem:[%s2629_s2 + $0x310] sm:$0xff]  ;;  %498 = vmatpush.msra.mxu1 %v251_v57  ;;  %v279_v63 = vld [vmem:[%s2629_s2 + $0x200] sm:$0xff]  ;;  %558 = vmatpush.msra.mxu2 %v281_v59  ;;  %v266_v58 = vld [vmem:[%s2629_s2 + $0x198] sm:$0xff] }
  0x20   :  { %v249_v61 = vld [vmem:[%s2629_s2 + $0x110] sm:$0xff]  ;;  %v311_v0 = vld [vmem:[%s2629_s2 + $0x300] sm:$0xff]  ;;  %617 = vmatpush.msra.mxu3 %v313_v60  ;;  %441 = vmatpush.msra.mxu0 %v215_v62  ;;  %v49_v59 = vld [vmem:[%s2631_s0 + $0x78] sm:$0xff] }
  0x21   :  { %499 = vmatpush.msra.mxu1 %v249_v61  ;;  %v247_v3 = vld [vmem:[%s2629_s2 + $0x100] sm:$0xff]  ;;  %v373_v4 = vld [vmem:[%s2629_s2 + $0x4f0] sm:$0xff]  ;;  %559 = vmatpush.msra.mxu2 %v279_v63  ;;  %v47_v60 = vld [vmem:[%s2631_s0 + $0x68] sm:$0xff] }
  0x22   :  { %v1197_v2 = vpop.eup %1196  ;;  %v381_v7 = vld [vmem:[%s2629_s2 + $0x530] sm:$0xff]  ;;  %618 = vmatpush.msra.mxu3 %v311_v0  ;;  %v371_v9 = vld [vmem:[%s2629_s2 + $0x4e0] sm:$0xff]  ;;  %662 = vmatpush.msrb.mxu0 %v373_v4 }
  0x23   :  { %v18_v5 = vadd.f32 1.0, %v1197_v2  ;;  %780 = vmatpush.msrb.mxu2 %v246_v1  ;;  %500 = vmatpush.msra.mxu1 %v247_v3  ;;  %v369_v13 = vld [vmem:[%s2629_s2 + $0x4d0] sm:$0xff]  ;;  %v367_v17 = vld [vmem:[%s2629_s2 + $0x4c0] sm:$0xff]  ;;  %v232_v3 = vld [vmem:[%s2629_s2 + $0x88] sm:$0xff] }
  0x24   :  { %839 = vmatpush.msrb.mxu3 %v278_v6  ;;  %663 = vmatpush.msrb.mxu0 %v371_v9  ;;  %v365_v26 = vld [vmem:[%s2629_s2 + $0x4b0] sm:$0xff]  ;;  %v34_v29 = vld [vmem:[%s2631_s0] sm:$0xff]  ;;  %v55_v6 = vld [vmem:[%s2631_s0 + $0xa8] sm:$0xff] }
  0x25   :  { %1198 = vrcp.f32 %v18_v5  ;;  %733 = vmatpush.msrb.mxu1 %v381_v7  ;;  %781 = vmatpush.msrb.mxu2 %v244_v8  ;;  %v30_v19 = vand.u32 2147483648, %v18_v5  ;;  %vm24_vm0 = vweird.f32 %v18_v5  ;;  %v28_v21 = vand.u32 2147483647, %v18_v5  ;;  %v36_v31 = vld [vmem:[%s2631_s0 + $0x10] sm:$0xff]  ;;  %v42_v43 = vld [vmem:[%s2631_s0 + $0x40] sm:$0xff]  ;;  %v53_v7 = vld [vmem:[%s2631_s0 + $0x98] sm:$0xff] }
  0x26   :  { %840 = vmatpush.msrb.mxu3 %v276_v10  ;;  %664 = vmatpush.msrb.mxu0 %v369_v13  ;;  %v40_v42 = vld [vmem:[%s2631_s0 + $0x30] sm:$0xff]  ;;  %v379_v44 = vld [vmem:[%s2629_s2 + $0x520] sm:$0xff] }
  0x27   :  { %782 = vmatpush.msrb.mxu2 %v242_v11  ;;  %v31_v23 = vor.u32 1.1754944e-38, %v30_v19  ;;  %vm29_vm3 = vcmp.eq.f32.partialorder %v28_v21, 8.507059e+37  ;;  %v363_v46 = vld [vmem:[%s2629_s2 + $0x4a0] sm:$0xff]  ;;  %734 = vmatpush.msrb.mxu1 %v379_v44  ;;  %v48_v55 = vld [vmem:[%s2631_s0 + $0x70] sm:$0xff] }
  0x28   :  { %841 = vmatpush.msrb.mxu3 %v274_v14  ;;  %665 = vmatpush.msrb.mxu0 %v367_v17  ;;  %v46_v54 = vld [vmem:[%s2631_s0 + $0x60] sm:$0xff]  ;;  %v361_v57 = vld [vmem:[%s2629_s2 + $0x490] sm:$0xff]  ;;  %v61_v14 = vld [vmem:[%s2631_s0 + $0xd8] sm:$0xff] }
  0x29   :  { %783 = vmatpush.msrb.mxu2 %v240_v15  ;;  %v52_v1 = vld [vmem:[%s2631_s0 + $0x90] sm:$0xff]  ;;  %v54_v2 = vld [vmem:[%s2631_s0 + $0xa0] sm:$0xff]  ;;  %v230_v15 = vld [vmem:[%s2629_s2 + $0x78] sm:$0xff] }
  0x2a   :  { %842 = vmatpush.msrb.mxu3 %v272_v18  ;;  %666 = vmatpush.msrb.mxu0 %v365_v26  ;;  %v359_v4 = vld [vmem:[%s2629_s2 + $0x480] sm:$0xff]  ;;  %v60_v13 = vld [vmem:[%s2631_s0 + $0xd0] sm:$0xff]  ;;  %v262_v17 = vld [vmem:[%s2629_s2 + $0x178] sm:$0xff] }
  0x2b   :  { %v1199_v12 = vpop.eup %1198  ;;  %784 = vmatpush.msrb.mxu2 %v238_v25  ;;  %v59_v18 = vld [vmem:[%s2631_s0 + $0xc8] sm:$0xff]  ;;  %v377_v19 = vld [vmem:[%s2629_s2 + $0x510] sm:$0xff]  ;;  %v66_v26 = vld [vmem:[%s2631_s0 + $0x100] sm:$0xff] }
  0x2c   :  { %v20_v16 = vmul.f32 %v1199_v12, %v18_v5  ;;  %vm25_vm1 = vweird.f32 %v1199_v12  ;;  %843 = vmatpush.msrb.mxu3 %v270_v27  ;;  %667 = vmatpush.msrb.mxu0 %v363_v46  ;;  %v264_v5 = vld [vmem:[%s2629_s2 + $0x188] sm:$0xff]  ;;  %v64_v25 = vld [vmem:[%s2631_s0 + $0xf0] sm:$0xff]  ;;  %v355_v27 = vld [vmem:[%s2629_s2 + $0x460] sm:$0xff] }
  0x2d   :  { %vm26_vm2 = vmor %vm24_vm0, %vm25_vm1  ;;  %785 = vmatpush.msrb.mxu2 %v236_v45  ;;  %735 = vmatpush.msrb.mxu1 %v377_v19  ;;  %v70_v45 = vld [vmem:[%s2631_s0 + $0x120] sm:$0xff]  ;;  %v72_v46 = vld [vmem:[%s2631_s0 + $0x130] sm:$0xff] }
  0x2e   :  { %v21_v20 = vsub.f32 1.0, %v20_v16  ;;  %844 = vmatpush.msrb.mxu3 %v268_v49  ;;  %668 = vmatpush.msrb.mxu0 %v361_v57  ;;  %v357_v16 = vld [vmem:[%s2629_s2 + $0x470] sm:$0xff]  ;;  %v258_v49 = vld [vmem:[%s2629_s2 + $0x158] sm:$0xff]  ;;  %v256_v57 = vld [vmem:[%s2629_s2 + $0x148] sm:$0xff] }
  0x2f   :  { %786 = vmatpush.msrb.mxu2 %v234_v56  ;;  %v351_v56 = vld [vmem:[%s2629_s2 + $0x440] sm:$0xff] }
  0x30   :  { %v22_v22 = vmul.f32 %v1199_v12, %v21_v20  ;;  %845 = vmatpush.msrb.mxu3 %v266_v58  ;;  %669 = vmatpush.msrb.mxu0 %v359_v4  ;;  %v228_v20 = vld [vmem:[%s2629_s2 + $0x68] sm:$0xff]  ;;  %v222_v4 = vld [vmem:[%s2629_s2 + $0x38] sm:$0xff]  ;;  %v375_v19 = vld [vmem:[%s2629_s2 + $0x500] sm:$0xff] }
  0x31   :  { %787 = vmatpush.msrb.mxu2 %v232_v3  ;;  %v78_v3 = vld [vmem:[%s2631_s0 + $0x160] sm:$0xff]  ;;  %736 = vmatpush.msrb.mxu1 %v375_v19  ;;  %v95_v19 = vld [vmem:[%s2631_s0 + $0x1e8] sm:$0xff] }
  0x32   :  { %v23_v24 = vadd.f32 %v1199_v12, %v22_v22  ;;  %846 = vmatpush.msrb.mxu3 %v264_v5  ;;  %670 = vmatpush.msrb.mxu0 %v357_v16  ;;  %v349_v5 = vld [vmem:[%s2629_s2 + $0x430] sm:$0xff] }
  0x33   :  { %788 = vmatpush.msrb.mxu2 %v230_v15 }
  0x34   :  { %v27_v28 = vsel %vm26_vm2, %v1199_v12, %v23_v24  ;;  %v58_v12 = vld [vmem:[%s2631_s0 + $0xc0] sm:$0xff]  ;;  %847 = vmatpush.msrb.mxu3 %v262_v17  ;;  %671 = vmatpush.msrb.mxu0 %v355_v27  ;;  %v83_v27 = vld [vmem:[%s2631_s0 + $0x188] sm:$0xff] }
  0x35   :  { %v1466_v30 = vsel %vm29_vm3, %v31_v23, %v27_v28  ;;  %789 = vmatpush.msrb.mxu2 %v228_v20  ;;  %v260_v28 = vld [vmem:[%s2629_s2 + $0x168] sm:$0xff]  ;;  %v82_v17 = vld [vmem:[%s2631_s0 + $0x180] sm:$0xff] }
  0x36   :  { %v1478_v34 = vperm.slane %v1466_v30, 0  ;;  %v1481_v35 = vperm.slane %v1466_v30, 2  ;;  %v1484_v36 = vperm.slane %v1466_v30, 3  ;;  %v1487_v37 = vperm.slane %v1466_v30, 1  ;;  %848 = vmatpush.msrb.mxu3 %v260_v28  ;;  %v220_v20 = vld [vmem:[%s2629_s2 + $0x28] sm:$0xff] }
  0x37   :  { %v252_v28 = vld [vmem:[%s2629_s2 + $0x128] sm:$0xff] }
  0x38   :  { %v1490_v38 = vmul.f32 %v1478_v34, %v34_v29  ;;  %v1493_v39 = vmul.f32 %v1481_v35, %v36_v31  ;;  %v1496_v40 = vmul.f32 %v1484_v36, %v37_v32  ;;  %v1499_v41 = vmul.f32 %v1487_v37, %v35_v33  ;;  %v226_v29 = vld [vmem:[%s2629_s2 + $0x58] sm:$0xff]  ;;  %v67_v31 = vld [vmem:[%s2631_s0 + $0x108] sm:$0xff]  ;;  %849 = vmatpush.msrb.mxu3 %v258_v49  ;;  %v345_v49 = vld [vmem:[%s2629_s2 + $0x410] sm:$0xff] }
  0x39   :  { %v1530_v50 = vmul.f32 %v1478_v34, %v40_v42  ;;  %v1533_v51 = vmul.f32 %v1481_v35, %v42_v43  ;;  %v1536_v52 = vmul.f32 %v1484_v36, %v43_v47  ;;  %v1539_v53 = vmul.f32 %v1487_v37, %v41_v48  ;;  %v65_v32 = vld [vmem:[%s2631_s0 + $0xf8] sm:$0xff]  ;;  %790 = vmatpush.msrb.mxu2 %v226_v29  ;;  %v353_v48 = vld [vmem:[%s2629_s2 + $0x450] sm:$0xff] }
  0x3a   :  { %442 = vmatmul.f32.vlgmr.msra.gmra.mxu0 %v1490_v38  ;;  %560 = vmatmul.f32.vlgmr.msra.gmra.mxu2 %v1493_v39  ;;  %v1567_v61 = vmul.f32 %v1478_v34, %v46_v54  ;;  %v1570_v62 = vmul.f32 %v1481_v35, %v48_v55  ;;  %v1573_v63 = vmul.f32 %v1484_v36, %v49_v59  ;;  %v73_v47 = vld [vmem:[%s2631_s0 + $0x138] sm:$0xff]  ;;  %v224_v54 = vld [vmem:[%s2629_s2 + $0x48] sm:$0xff] }
  0x3b   :  { %619 = vmatmul.f32.vlgmr.msra.gmra.mxu3 %v1496_v40  ;;  %501 = vmatmul.f32.vlgmr.msra.gmra.mxu1 %v1499_v41  ;;  %v1576_v0 = vmul.f32 %v1487_v37, %v47_v60  ;;  %v1604_v8 = vmul.f32 %v1478_v34, %v52_v1  ;;  %v1607_v9 = vmul.f32 %v1481_v35, %v54_v2  ;;  %v71_v55 = vld [vmem:[%s2631_s0 + $0x128] sm:$0xff]  ;;  %v76_v2 = vld [vmem:[%s2631_s0 + $0x150] sm:$0xff] }
  0x3c   :  { %v1610_v10 = vmul.f32 %v1484_v36, %v55_v6  ;;  %v1613_v11 = vmul.f32 %v1487_v37, %v53_v7  ;;  %v1647_v21 = vmul.f32 %v1478_v34, %v58_v12  ;;  %v1650_v22 = vmul.f32 %v1481_v35, %v60_v13  ;;  %672 = vmatpush.msrb.mxu0 %v353_v48  ;;  %v254_v6 = vld [vmem:[%s2629_s2 + $0x138] sm:$0xff]  ;;  %v79_v7 = vld [vmem:[%s2631_s0 + $0x168] sm:$0xff] }
  0x3d   :  { %v1653_v23 = vmul.f32 %v1484_v36, %v61_v14  ;;  %v1656_v24 = vmul.f32 %v1487_v37, %v59_v18  ;;  %v1684_v33 = vmul.f32 %v1478_v34, %v64_v25  ;;  %v1687_v42 = vmul.f32 %v1481_v35, %v66_v26  ;;  %791 = vmatpush.msrb.mxu2 %v224_v54  ;;  %v77_v12 = vld [vmem:[%s2631_s0 + $0x158] sm:$0xff]  ;;  %v84_v18 = vld [vmem:[%s2631_s0 + $0x190] sm:$0xff]  ;;  %v347_v25 = vld [vmem:[%s2629_s2 + $0x420] sm:$0xff] }
  0x3e   :  { %v1690_v43 = vmul.f32 %v1484_v36, %v67_v31  ;;  %v1693_v44 = vmul.f32 %v1487_v37, %v65_v32  ;;  %v1727_v58 = vmul.f32 %v1478_v34, %v70_v45  ;;  %v1730_v59 = vmul.f32 %v1481_v35, %v72_v46  ;;  %673 = vmatpush.msrb.mxu0 %v351_v56  ;;  %v85_v26 = vld [vmem:[%s2631_s0 + $0x198] sm:$0xff]  ;;  %v88_v46 = vld [vmem:[%s2631_s0 + $0x1b0] sm:$0xff] }
  0x3f   :  { %850 = vmatpush.msrb.mxu3 %v256_v57  ;;  %v1733_v60 = vmul.f32 %v1484_v36, %v73_v47  ;;  %v1736_v1 = vmul.f32 %v1487_v37, %v71_v55  ;;  %792 = vmatpush.msrb.mxu2 %v222_v4  ;;  %v1764_v13 = vmul.f32 %v1478_v34, %v76_v2  ;;  %v90_v47 = vld [vmem:[%s2631_s0 + $0x1c0] sm:$0xff]  ;;  %v218_v48 = vld [vmem:[%s2629_s2 + $0x18] sm:$0xff]  ;;  %v91_v55 = vld [vmem:[%s2631_s0 + $0x1c8] sm:$0xff] }
  0x40   :  { %674 = vmatpush.msrb.mxu0 %v349_v5  ;;  %v1767_v14 = vmul.f32 %v1481_v35, %v78_v3  ;;  %v1770_v15 = vmul.f32 %v1484_v36, %v79_v7  ;;  %v1773_v16 = vmul.f32 %v1487_v37, %v77_v12  ;;  %v1804_v29 = vmul.f32 %v1478_v34, %v82_v17  ;;  %v250_v54 = vld [vmem:[%s2629_s2 + $0x118] sm:$0xff]  ;;  %v94_v5 = vld [vmem:[%s2631_s0 + $0x1e0] sm:$0xff]  ;;  %v216_v7 = vld [vmem:[%s2629_s2 + $0x8] sm:$0xff] }
  0x41   :  { %851 = vmatpush.msrb.mxu3 %v254_v6  ;;  %793 = vmatpush.msrb.mxu2 %v220_v20  ;;  %v1807_v31 = vmul.f32 %v1481_v35, %v84_v18  ;;  %v1810_v32 = vmul.f32 %v1484_v36, %v85_v26  ;;  %v1813_v45 = vmul.f32 %v1487_v37, %v83_v27  ;;  %v89_v56 = vld [vmem:[%s2631_s0 + $0x1b8] sm:$0xff]  ;;  %v96_v6 = vld [vmem:[%s2631_s0 + $0x1f0] sm:$0xff]  ;;  %v343_v12 = vld [vmem:[%s2629_s2 + $0x400] sm:$0xff] }
  0x42   :  { %445 = vmatmul.f32.gmra.mxu0 %v1530_v50  ;;  %563 = vmatmul.f32.gmra.mxu2 %v1533_v51  ;;  %2650 = vst [vmem:[#allocation2_spill] sm:$0xff] %v1770_v15  ;;  %v1841_v57 = vmul.f32 %v1478_v34, %v88_v46  ;;  %v1844_v2 = vmul.f32 %v1481_v35, %v90_v47  ;;  %v248_v17 = vld [vmem:[%s2629_s2 + $0x108] sm:$0xff]  ;;  %v97_v18 = vld [vmem:[%s2631_s0 + $0x1f8] sm:$0xff]  ;;  %v102_v46 = vld [vmem:[%s2631_s0 + $0x220] sm:$0xff] }
  0x43   :  { %622 = vmatmul.f32.gmra.mxu3 %v1536_v52  ;;  %504 = vmatmul.f32.gmra.mxu1 %v1539_v53  ;;  %2651 = vst [vmem:[#allocation3_spill] sm:$0xff] %v1807_v31  ;;  %v1847_v3 = vmul.f32 %v1484_v36, %v91_v55  ;;  %v1850_v4 = vmul.f32 %v1487_v37, %v89_v56  ;;  %v103_v47 = vld [vmem:[%s2631_s0 + $0x228] sm:$0xff]  ;;  %v101_v55 = vld [vmem:[%s2631_s0 + $0x218] sm:$0xff] }
  0x44   :  { %675 = vmatpush.msrb.mxu0 %v347_v25  ;;  %852 = vmatpush.msrb.mxu3 %v252_v28  ;;  %2652 = vst [vmem:[#allocation4_spill] sm:$0xff] %v1810_v32  ;;  %v1878_v20 = vmul.f32 %v1478_v34, %v94_v5  ;;  %v1881_v25 = vmul.f32 %v1481_v35, %v96_v6  ;;  %v100_v28 = vld [vmem:[%s2631_s0 + $0x210] sm:$0xff]  ;;  %v342_v56 = vld [vmem:[%s2629_s2 + $0x3f8] sm:$0xff]  ;;  %v372_v5 = vld [vmem:[%s2629_s2 + $0x4e8] sm:$0xff] }
  0x45   :  { %794 = vmatpush.msrb.mxu2 %v218_v48  ;;  %2653 = vst [vmem:[#allocation5_spill] sm:$0xff] %v1844_v2  ;;  %v1884_v26 = vmul.f32 %v1484_v36, %v97_v18  ;;  %v1887_v27 = vmul.f32 %v1487_v37, %v95_v19  ;;  %v374_v48 = vld [vmem:[%s2629_s2 + $0x4f8] sm:$0xff]  ;;  %957 = vmatpush.msra.mxu1 %v342_v56  ;;  %v106_v18 = vld [vmem:[%s2631_s0 + $0x240] sm:$0xff]  ;;  %v108_v19 = vld [vmem:[%s2631_s0 + $0x250] sm:$0xff] }
  0x46   :  { %676 = vmatpush.msrb.mxu0 %v345_v49  ;;  %853 = vmatpush.msrb.mxu3 %v250_v54  ;;  %2654 = vst [vmem:[#allocation6_spill] sm:$0xff] %v1847_v3  ;;  %v310_v49 = vld [vmem:[%s2629_s2 + $0x2f8] sm:$0xff]  ;;  %v1921_v6 = vmul.f32 %v1478_v34, %v100_v28  ;;  %v308_v28 = vld [vmem:[%s2629_s2 + $0x2e8] sm:$0xff] }
  0x47   :  { %795 = vmatpush.msrb.mxu2 %v216_v7  ;;  %2655 = vst [vmem:[#allocation7_spill] sm:$0xff] %v1881_v25  ;;  %v382_v54 = vld [vmem:[%s2629_s2 + $0x538] sm:$0xff]  ;;  %v1924_v7 = vmul.f32 %v1481_v35, %v102_v46  ;;  %v340_v46 = vld [vmem:[%s2629_s2 + $0x3e8] sm:$0xff] }
  0x48   :  { %677 = vmatpush.msrb.mxu0 %v343_v12  ;;  %854 = vmatpush.msrb.mxu3 %v248_v17  ;;  %2656 = vst [vmem:[#allocation8_spill] sm:$0xff] %v1884_v26  ;;  %v1927_v12 = vmul.f32 %v1484_v36, %v103_v47  ;;  %v1930_v17 = vmul.f32 %v1487_v37, %v101_v55  ;;  %v109_v47 = vld [vmem:[%s2631_s0 + $0x258] sm:$0xff] }
  0x49   :  { %1016 = vmatpush.msra.mxu2 %v374_v48  ;;  %2657 = vst [vmem:[#allocation9_spill] sm:$0xff] %v1924_v7  ;;  %v107_v48 = vld [vmem:[%s2631_s0 + $0x248] sm:$0xff]  ;;  %958 = vmatpush.msra.mxu1 %v340_v46  ;;  %v1961_v55 = vmul.f32 %v1484_v36, %v109_v47  ;;  %v338_v46 = vld [vmem:[%s2629_s2 + $0x3d8] sm:$0xff] }
  0x4a   :  { %448 = vmatmul.f32.gmra.mxu0 %v1567_v61  ;;  %566 = vmatmul.f32.gmra.mxu2 %v1570_v62  ;;  %2658 = vst [vmem:[#allocation10_spill] sm:$0xff] %v1927_v12  ;;  %v1964_v56 = vmul.f32 %v1487_v37, %v107_v48  ;;  %v115_v47 = vld [vmem:[%s2631_s0 + $0x288] sm:$0xff]  ;;  %v113_v48 = vld [vmem:[%s2631_s0 + $0x278] sm:$0xff] }
  0x4b   :  { %625 = vmatmul.f32.gmra.mxu3 %v1573_v63  ;;  %507 = vmatmul.f32.gmra.mxu1 %v1576_v0  ;;  %2660 = vst [vmem:[#allocation12_spill] sm:$0xff] %v1961_v55 }
  0x4c   :  { %898 = vmatpush.msra.mxu0 %v310_v49  ;;  %1087 = vmatpush.msra.mxu3 %v382_v54  ;;  %v1955_v49 = vmul.f32 %v1478_v34, %v106_v18  ;;  %v1958_v54 = vmul.f32 %v1481_v35, %v108_v19  ;;  %v112_v18 = vld [vmem:[%s2631_s0 + $0x270] sm:$0xff]  ;;  %v114_v19 = vld [vmem:[%s2631_s0 + $0x280] sm:$0xff] }
  0x4d   :  { %1017 = vmatpush.msra.mxu2 %v372_v5  ;;  %v370_v5 = vld [vmem:[%s2629_s2 + $0x4d8] sm:$0xff]  ;;  %959 = vmatpush.msra.mxu1 %v338_v46 }
  0x4e   :  { %899 = vmatpush.msra.mxu0 %v308_v28  ;;  %2659 = vst [vmem:[#allocation11_spill] sm:$0xff] %v1958_v54  ;;  %v306_v28 = vld [vmem:[%s2629_s2 + $0x2d8] sm:$0xff] }
  0x4f   :  { %1018 = vmatpush.msra.mxu2 %v370_v5  ;;  %v1992_v5 = vmul.f32 %v1478_v34, %v112_v18  ;;  %v2012_v34 = vperm.slane %v1466_v30, 4  ;;  %v302_v46 = vld [vmem:[%s2629_s2 + $0x2b8] sm:$0xff] }
  0x50   :  { %900 = vmatpush.msra.mxu0 %v306_v28  ;;  %v304_v28 = vld [vmem:[%s2629_s2 + $0x2c8] sm:$0xff] }
  0x52   :  { %451 = vmatmul.f32.gmra.mxu0 %v1604_v8  ;;  %569 = vmatmul.f32.gmra.mxu2 %v1607_v9 }
  0x53   :  { %628 = vmatmul.f32.gmra.mxu3 %v1610_v10  ;;  %510 = vmatmul.f32.gmra.mxu1 %v1613_v11 }
  0x54   :  { %901 = vmatpush.msra.mxu0 %v304_v28  ;;  %v334_v28 = vld [vmem:[%s2629_s2 + $0x3b8] sm:$0xff] }
  0x56   :  { %902 = vmatpush.msra.mxu0 %v302_v46  ;;  %v50_v46 = vld [vmem:[%s2631_s0 + $0x80] sm:$0xff] }
  0x5a   :  { %454 = vmatmul.f32.gmra.mxu0 %v1647_v21  ;;  %572 = vmatmul.f32.gmra.mxu2 %v1650_v22 }
  0x5b   :  { %631 = vmatmul.f32.gmra.mxu3 %v1653_v23  ;;  %513 = vmatmul.f32.gmra.mxu1 %v1656_v24 }
  0x62   :  { %457 = vmatmul.f32.gmra.mxu0 %v1684_v33  ;;  %575 = vmatmul.f32.gmra.mxu2 %v1687_v42 }
  0x63   :  { %634 = vmatmul.f32.gmra.mxu3 %v1690_v43  ;;  %516 = vmatmul.f32.gmra.mxu1 %v1693_v44 }
  0x6a   :  { %460 = vmatmul.f32.gmra.mxu0 %v1727_v58  ;;  %578 = vmatmul.f32.gmra.mxu2 %v1730_v59 }
  0x6b   :  { %637 = vmatmul.f32.gmra.mxu3 %v1733_v60  ;;  %519 = vmatmul.f32.gmra.mxu1 %v1736_v1 }
  0x72   :  { %463 = vmatmul.f32.gmra.mxu0 %v1764_v13  ;;  %581 = vmatmul.f32.gmra.mxu2 %v1767_v14 }
  0x73   :  { %640 = vmatmul.f32.gmra.mxu3 %v1770_v15  ;;  %522 = vmatmul.f32.gmra.mxu1 %v1773_v16 }
  0x7a   :  { %466 = vmatmul.f32.gmra.mxu0 %v1804_v29  ;;  %584 = vmatmul.f32.gmra.mxu2 %v1807_v31 }
  0x7b   :  { %643 = vmatmul.f32.gmra.mxu3 %v1810_v32  ;;  %525 = vmatmul.f32.gmra.mxu1 %v1813_v45 }
  0x82   :  { %469 = vmatmul.f32.gmra.mxu0 %v1841_v57  ;;  %587 = vmatmul.f32.gmra.mxu2 %v1844_v2 }
  0x83   :  { %646 = vmatmul.f32.gmra.mxu3 %v1847_v3  ;;  %528 = vmatmul.f32.gmra.mxu1 %v1850_v4 }
  0x8a   :  { %472 = vmatmul.f32.gmra.mxu0 %v1878_v20  ;;  %590 = vmatmul.f32.gmra.mxu2 %v1881_v25 }
  0x8b   :  { %649 = vmatmul.f32.gmra.mxu3 %v1884_v26  ;;  %531 = vmatmul.f32.gmra.mxu1 %v1887_v27 }
  0x92   :  { %475 = vmatmul.f32.gmra.mxu0 %v1921_v6  ;;  %593 = vmatmul.f32.gmra.mxu2 %v1924_v7  ;;  %v368_v7 = vld [vmem:[%s2629_s2 + $0x4c8] sm:$0xff] }
  0x93   :  { %652 = vmatmul.f32.gmra.mxu3 %v1927_v12  ;;  %534 = vmatmul.f32.gmra.mxu1 %v1930_v17  ;;  %v2001_v12 = vmul.f32 %v1487_v37, %v113_v48  ;;  %v336_v37 = vld [vmem:[%s2629_s2 + $0x3c8] sm:$0xff]  ;;  %v44_v48 = vld [vmem:[%s2631_s0 + $0x50] sm:$0xff] }
  0x94   :  { %1019 = vmatpush.msra.mxu2 %v368_v7  ;;  %v39_v7 = vld [vmem:[%s2631_s0 + $0x28] sm:$0xff]  ;;  %960 = vmatpush.msra.mxu1 %v336_v37 }
  0x95   :  { %v364_v37 = vld [vmem:[%s2629_s2 + $0x4a8] sm:$0xff] }
  0x96   :  { %961 = vmatpush.msra.mxu1 %v334_v28 }
  0x9a   :  { %478 = vmatmul.f32.gmra.mxu0 %v1955_v49  ;;  %596 = vmatmul.f32.gmra.mxu2 %v1958_v54  ;;  %v1998_v54 = vmul.f32 %v1484_v36, %v115_v47  ;;  %v2020_v36 = vperm.slane %v1466_v30, 5  ;;  %v366_v30 = vld [vmem:[%s2629_s2 + $0x4b8] sm:$0xff]  ;;  %v380_v47 = vld [vmem:[%s2629_s2 + $0x528] sm:$0xff] }
  0x9b   :  { %655 = vmatmul.f32.gmra.mxu3 %v1961_v55  ;;  %537 = vmatmul.f32.gmra.mxu1 %v1964_v56  ;;  %v1995_v55 = vmul.f32 %v1481_v35, %v114_v19  ;;  %v38_v35 = vld [vmem:[%s2631_s0 + $0x20] sm:$0xff] }
  0x9c   :  { %2662 = vst [vmem:[#allocation14_spill] sm:$0xff] %v1998_v54  ;;  %v2029_v18 = vmul.f32 %v2012_v34, %v38_v35  ;;  %v2032_v19 = vmul.f32 %v2020_v36, %v39_v7  ;;  %1020 = vmatpush.msra.mxu2 %v366_v30  ;;  %v45_v35 = vld [vmem:[%s2631_s0 + $0x58] sm:$0xff]  ;;  %1088 = vmatpush.msra.mxu3 %v380_v47  ;;  %v300_v7 = vld [vmem:[%s2629_s2 + $0x2a8] sm:$0xff] }
  0x9d   :  { %2661 = vst [vmem:[#allocation13_spill] sm:$0xff] %v1995_v55  ;;  %903 = vmatpush.msra.mxu0 %v300_v7  ;;  %v332_v30 = vld [vmem:[%s2629_s2 + $0x3a8] sm:$0xff]  ;;  %v362_v47 = vld [vmem:[%s2629_s2 + $0x498] sm:$0xff] }
  0x9e   :  { %1021 = vmatpush.msra.mxu2 %v364_v37  ;;  %962 = vmatpush.msra.mxu1 %v332_v30  ;;  %v298_v37 = vld [vmem:[%s2629_s2 + $0x298] sm:$0xff]  ;;  %v56_v30 = vld [vmem:[%s2631_s0 + $0xb0] sm:$0xff] }
  0x9f   :  { %v330_v7 = vld [vmem:[%s2629_s2 + $0x398] sm:$0xff]  ;;  %904 = vmatpush.msra.mxu0 %v298_v37 }
  0xa0   :  { %1022 = vmatpush.msra.mxu2 %v362_v47  ;;  %963 = vmatpush.msra.mxu1 %v330_v7  ;;  %v2113_v7 = vmul.f32 %v2012_v34, %v56_v30  ;;  %v62_v30 = vld [vmem:[%s2631_s0 + $0xe0] sm:$0xff] }
  0xa2   :  { %481 = vmatmul.f32.gmra.mxu0 %v1992_v5  ;;  %599 = vmatmul.f32.gmra.mxu2 %v1995_v55 }
  0xa3   :  { %658 = vmatmul.f32.gmra.mxu3 %v1998_v54  ;;  %540 = vmatmul.f32.gmra.mxu1 %v2001_v12 }
  0xaa   :  { %678 = vmatmul.f32.vlgmr.msrb.gmra.mxu0 %v2029_v18  ;;  %796 = vmatmul.f32.vlgmr.msrb.gmra.mxu2 %v1490_v38  ;;  %v2058_v38 = vmul.f32 %v2012_v34, %v44_v48  ;;  %v51_v48 = vld [vmem:[%s2631_s0 + $0x88] sm:$0xff] }
  0xab   :  { %855 = vmatmul.f32.vlgmr.msrb.gmra.mxu3 %v1499_v41  ;;  %1168 = vmatmul.msk.f32.vlgmr.msrb.gmra.mxu1 %vm383_vm4, %v2032_v19  ;;  %v2061_v41 = vmul.f32 %v2020_v36, %v45_v35  ;;  %v2090_v28 = vmul.f32 %v2020_v36, %v51_v48  ;;  %v57_v48 = vld [vmem:[%s2631_s0 + $0xb8] sm:$0xff] }
  0xac   :  { %v2116_v55 = vmul.f32 %v2020_v36, %v57_v48 }
  0xb2   :  { %681 = vmatmul.f32.gmra.mxu0 %v2058_v38  ;;  %799 = vmatmul.f32.gmra.mxu2 %v1530_v50  ;;  %v2087_v50 = vmul.f32 %v2012_v34, %v50_v46  ;;  %v360_v46 = vld [vmem:[%s2629_s2 + $0x488] sm:$0xff] }
  0xb3   :  { %858 = vmatmul.f32.gmra.mxu3 %v1539_v53  ;;  %1169 = vmatmul.msk.f32.gmra.mxu1 %vm383_vm4, %v2061_v41 }
  0xb4   :  { %1023 = vmatpush.msra.mxu2 %v360_v46  ;;  %v358_v46 = vld [vmem:[%s2629_s2 + $0x478] sm:$0xff] }
  0xb6   :  { %1024 = vmatpush.msra.mxu2 %v358_v46  ;;  %v356_v46 = vld [vmem:[%s2629_s2 + $0x468] sm:$0xff] }
  0xb7   :  { %v443_v53 = vpop.f32.mrf.mxu0 }
  0xb8   :  { %v502_v35 = vpop.f32.mrf.mxu1  ;;  %1025 = vmatpush.msra.mxu2 %v356_v46  ;;  %v74_v46 = vld [vmem:[%s2631_s0 + $0x140] sm:$0xff] }
  0xb9   :  { %v503_v47 = vadd.f32 %v502_v35, %v443_v53  ;;  %v296_v53 = vld [vmem:[%s2629_s2 + $0x288] sm:$0xff] }
  0xba   :  { %684 = vmatmul.f32.gmra.mxu0 %v2087_v50  ;;  %802 = vmatmul.f32.gmra.mxu2 %v1567_v61  ;;  %v328_v35 = vld [vmem:[%s2629_s2 + $0x388] sm:$0xff] }
  0xbb   :  { %861 = vmatmul.f32.gmra.mxu3 %v1576_v0  ;;  %1170 = vmatmul.msk.f32.gmra.mxu1 %vm383_vm4, %v2090_v28 }
  0xbc   :  { %905 = vmatpush.msra.mxu0 %v296_v53  ;;  %964 = vmatpush.msra.mxu1 %v328_v35  ;;  %v2147_v53 = vmul.f32 %v2012_v34, %v62_v30  ;;  %v68_v30 = vld [vmem:[%s2631_s0 + $0x110] sm:$0xff] }
  0xbd   :  { %v561_v61 = vpop.f32.mrf.mxu2 }
  0xbe   :  { %v562_v37 = vadd.f32 %v561_v61, %v503_v47  ;;  %v620_v0 = vpop.f32.mrf.mxu3  ;;  %v294_v47 = vld [vmem:[%s2629_s2 + $0x278] sm:$0xff] }
  0xbf   :  { %v446_v54 = vpop.f32.mrf.mxu0  ;;  %906 = vmatpush.msra.mxu0 %v294_v47  ;;  %v292_v47 = vld [vmem:[%s2629_s2 + $0x268] sm:$0xff] }
  0xc0   :  { %v2118_v26 = vadd.f32 %v620_v0, %v562_v37  ;;  %v505_v25 = vpop.f32.mrf.mxu1 }
  0xc1   :  { %v506_v48 = vadd.f32 %v505_v25, %v446_v54  ;;  %v326_v54 = vld [vmem:[%s2629_s2 + $0x378] sm:$0xff]  ;;  %907 = vmatpush.msra.mxu0 %v292_v47 }
  0xc2   :  { %687 = vmatmul.f32.gmra.mxu0 %v2113_v7  ;;  %805 = vmatmul.f32.gmra.mxu2 %v1604_v8  ;;  %v378_v8 = vld [vmem:[%s2629_s2 + $0x518] sm:$0xff] }
  0xc3   :  { %864 = vmatmul.f32.gmra.mxu3 %v1613_v11  ;;  %1171 = vmatmul.msk.f32.gmra.mxu1 %vm383_vm4, %v2116_v55  ;;  %v63_v11 = vld [vmem:[%s2631_s0 + $0xe8] sm:$0xff]  ;;  %v322_v47 = vld [vmem:[%s2629_s2 + $0x358] sm:$0xff] }
  0xc4   :  { %1089 = vmatpush.msra.mxu3 %v378_v8  ;;  %v2150_v3 = vmul.f32 %v2020_v36, %v63_v11  ;;  %965 = vmatpush.msra.mxu1 %v326_v54 }
  0xc5   :  { %v564_v61 = vpop.f32.mrf.mxu2 }
  0xc6   :  { %v565_v37 = vadd.f32 %v564_v61, %v506_v48  ;;  %v623_v0 = vpop.f32.mrf.mxu3  ;;  %v69_v48 = vld [vmem:[%s2631_s0 + $0x118] sm:$0xff]  ;;  %v2175_v61 = vmul.f32 %v2012_v34, %v68_v30 }
  0xc7   :  { %v449_v35 = vpop.f32.mrf.mxu0  ;;  %v290_v30 = vld [vmem:[%s2629_s2 + $0x258] sm:$0xff] }
  0xc8   :  { %v2152_v2 = vadd.f32 %v623_v0, %v565_v37  ;;  %v508_v25 = vpop.f32.mrf.mxu1  ;;  %v2178_v0 = vmul.f32 %v2020_v36, %v69_v48  ;;  %908 = vmatpush.msra.mxu0 %v290_v30  ;;  %v320_v30 = vld [vmem:[%s2629_s2 + $0x348] sm:$0xff] }
  0xc9   :  { %v509_v8 = vadd.f32 %v508_v25, %v449_v35  ;;  %v324_v35 = vld [vmem:[%s2629_s2 + $0x368] sm:$0xff]  ;;  %v354_v25 = vld [vmem:[%s2629_s2 + $0x458] sm:$0xff] }
  0xca   :  { %690 = vmatmul.f32.gmra.mxu0 %v2147_v53  ;;  %808 = vmatmul.f32.gmra.mxu2 %v1647_v21 }
  0xcb   :  { %867 = vmatmul.f32.gmra.mxu3 %v1656_v24  ;;  %1172 = vmatmul.msk.f32.gmra.mxu1 %vm383_vm4, %v2150_v3 }
  0xcc   :  { %966 = vmatpush.msra.mxu1 %v324_v35  ;;  %1026 = vmatpush.msra.mxu2 %v354_v25 }
  0xcd   :  { %v567_v21 = vpop.f32.mrf.mxu2 }
  0xce   :  { %v568_v24 = vadd.f32 %v567_v21, %v509_v8  ;;  %v626_v11 = vpop.f32.mrf.mxu3  ;;  %967 = vmatpush.msra.mxu1 %v322_v47 }
  0xcf   :  { %v452_v37 = vpop.f32.mrf.mxu0 }
  0xd0   :  { %v2180_v54 = vadd.f32 %v626_v11, %v568_v24  ;;  %v511_v32 = vpop.f32.mrf.mxu1  ;;  %v2206_v24 = vmul.f32 %v2012_v34, %v74_v46  ;;  %v80_v46 = vld [vmem:[%s2631_s0 + $0x170] sm:$0xff]  ;;  %968 = vmatpush.msra.mxu1 %v320_v30  ;;  %v318_v30 = vld [vmem:[%s2629_s2 + $0x338] sm:$0xff] }
  0xd1   :  { %v512_v8 = vadd.f32 %v511_v32, %v452_v37  ;;  %v352_v32 = vld [vmem:[%s2629_s2 + $0x448] sm:$0xff] }
  0xd2   :  { %693 = vmatmul.f32.gmra.mxu0 %v2175_v61  ;;  %811 = vmatmul.f32.gmra.mxu2 %v1684_v33  ;;  %v75_v33 = vld [vmem:[%s2631_s0 + $0x148] sm:$0xff] }
  0xd3   :  { %870 = vmatmul.f32.gmra.mxu3 %v1693_v44  ;;  %1173 = vmatmul.msk.f32.gmra.mxu1 %vm383_vm4, %v2178_v0  ;;  %v2209_v35 = vmul.f32 %v2020_v36, %v75_v33  ;;  %v288_v37 = vld [vmem:[%s2629_s2 + $0x248] sm:$0xff] }
  0xd4   :  { %1027 = vmatpush.msra.mxu2 %v352_v32  ;;  %909 = vmatpush.msra.mxu0 %v288_v37  ;;  %v376_v37 = vld [vmem:[%s2629_s2 + $0x508] sm:$0xff] }
  0xd5   :  { %v570_v44 = vpop.f32.mrf.mxu2  ;;  %1090 = vmatpush.msra.mxu3 %v376_v37  ;;  %969 = vmatpush.msra.mxu1 %v318_v30  ;;  %v316_v37 = vld [vmem:[%s2629_s2 + $0x328] sm:$0xff]  ;;  %v346_v30 = vld [vmem:[%s2629_s2 + $0x418] sm:$0xff] }
  0xd6   :  { %v571_v48 = vadd.f32 %v570_v44, %v512_v8  ;;  %v629_v21 = vpop.f32.mrf.mxu3  ;;  %v81_v8 = vld [vmem:[%s2631_s0 + $0x178] sm:$0xff]  ;;  %v2234_v44 = vmul.f32 %v2012_v34, %v80_v46  ;;  %v86_v46 = vld [vmem:[%s2631_s0 + $0x1a0] sm:$0xff] }
  0xd7   :  { %v455_v11 = vpop.f32.mrf.mxu0  ;;  %970 = vmatpush.msra.mxu1 %v316_v37  ;;  %v98_v37 = vld [vmem:[%s2631_s0 + $0x200] sm:$0xff] }
  0xd8   :  { %v2211_v25 = vadd.f32 %v629_v21, %v571_v48  ;;  %v514_v31 = vpop.f32.mrf.mxu1  ;;  %v2237_v21 = vmul.f32 %v2020_v36, %v81_v8  ;;  %v87_v8 = vld [vmem:[%s2631_s0 + $0x1a8] sm:$0xff] }
  0xd9   :  { %v515_v47 = vadd.f32 %v514_v31, %v455_v11  ;;  %v350_v31 = vld [vmem:[%s2629_s2 + $0x438] sm:$0xff] }
  0xda   :  { %696 = vmatmul.f32.gmra.mxu0 %v2206_v24  ;;  %814 = vmatmul.f32.gmra.mxu2 %v1727_v58  ;;  %2663 = vst [vmem:[#allocation15_spill] sm:$0xff] %v2237_v21  ;;  %v286_v11 = vld [vmem:[%s2629_s2 + $0x238] sm:$0xff] }
  0xdb   :  { %873 = vmatmul.f32.gmra.mxu3 %v1736_v1  ;;  %1174 = vmatmul.msk.f32.gmra.mxu1 %vm383_vm4, %v2209_v35 }
  0xdc   :  { %1028 = vmatpush.msra.mxu2 %v350_v31  ;;  %910 = vmatpush.msra.mxu0 %v286_v11  ;;  %v2268_v31 = vmul.f32 %v2020_v36, %v87_v8  ;;  %v93_v8 = vld [vmem:[%s2631_s0 + $0x1d8] sm:$0xff] }
  0xdd   :  { %v573_v58 = vpop.f32.mrf.mxu2 }
  0xde   :  { %v574_v1 = vadd.f32 %v573_v58, %v515_v47  ;;  %v632_v33 = vpop.f32.mrf.mxu3  ;;  %2664 = vst [vmem:[#allocation16_spill] sm:$0xff] %v2268_v31 }
  0xdf   :  { %v458_v48 = vpop.f32.mrf.mxu0 }
  0xe0   :  { %v2239_v32 = vadd.f32 %v632_v33, %v574_v1  ;;  %v517_v15 = vpop.f32.mrf.mxu1  ;;  %v2265_v1 = vmul.f32 %v2012_v34, %v86_v46  ;;  %v92_v46 = vld [vmem:[%s2631_s0 + $0x1d0] sm:$0xff] }
  0xe1   :  { %v518_v47 = vadd.f32 %v517_v15, %v458_v48  ;;  %v348_v15 = vld [vmem:[%s2629_s2 + $0x428] sm:$0xff] }
  0xe2   :  { %699 = vmatmul.f32.gmra.mxu0 %v2234_v44  ;;  %817 = vmatmul.f32.gmra.mxu2 %v1764_v13  ;;  %v284_v48 = vld [vmem:[%s2629_s2 + $0x228] sm:$0xff] }
  0xe3   :  { %876 = vmatmul.f32.gmra.mxu3 %v1773_v16  ;;  %1175 = vmatmul.msk.f32.gmra.mxu1 %vm383_vm4, %v2237_v21 }
  0xe4   :  { %1029 = vmatpush.msra.mxu2 %v348_v15  ;;  %911 = vmatpush.msra.mxu0 %v284_v48  ;;  %v2299_v15 = vmul.f32 %v2020_v36, %v93_v8 }
  0xe5   :  { %v576_v13 = vpop.f32.mrf.mxu2 }
  0xe6   :  { %v577_v16 = vadd.f32 %v576_v13, %v518_v47  ;;  %v635_v58 = vpop.f32.mrf.mxu3  ;;  %1030 = vmatpush.msra.mxu2 %v346_v30 }
  0xe7   :  { %v461_v33 = vpop.f32.mrf.mxu0 }
  0xe8   :  { %v2270_v11 = vadd.f32 %v635_v58, %v577_v16  ;;  %v520_v21 = vpop.f32.mrf.mxu1  ;;  %v2296_v16 = vmul.f32 %v2012_v34, %v92_v46  ;;  %v344_v46 = vld [vmem:[%s2629_s2 + $0x408] sm:$0xff] }
  0xe9   :  { %v521_v47 = vadd.f32 %v520_v21, %v461_v33  ;;  %v282_v21 = vld [vmem:[%s2629_s2 + $0x218] sm:$0xff]  ;;  %1031 = vmatpush.msra.mxu2 %v344_v46 }
  0xea   :  { %702 = vmatmul.f32.gmra.mxu0 %v2265_v1  ;;  %820 = vmatmul.f32.gmra.mxu2 %v1804_v29  ;;  %v314_v33 = vld [vmem:[%s2629_s2 + $0x318] sm:$0xff] }
  0xeb   :  { %879 = vmatmul.f32.gmra.mxu3 %v1813_v45  ;;  %1176 = vmatmul.msk.f32.gmra.mxu1 %vm383_vm4, %v2268_v31 }
  0xec   :  { %912 = vmatpush.msra.mxu0 %v282_v21  ;;  %971 = vmatpush.msra.mxu1 %v314_v33 }
  0xed   :  { %v579_v29 = vpop.f32.mrf.mxu2 }
  0xee   :  { %v580_v45 = vadd.f32 %v579_v29, %v521_v47  ;;  %v638_v13 = vpop.f32.mrf.mxu3  ;;  %v99_v47 = vld [vmem:[%s2631_s0 + $0x208] sm:$0xff]  ;;  %v2324_v29 = vmul.f32 %v2012_v34, %v98_v37  ;;  %v104_v37 = vld [vmem:[%s2631_s0 + $0x230] sm:$0xff] }
  0xef   :  { %v464_v58 = vpop.f32.mrf.mxu0 }
  0xf0   :  { %v2301_v48 = vadd.f32 %v638_v13, %v580_v45  ;;  %v523_v31 = vpop.f32.mrf.mxu1  ;;  %v2327_v13 = vmul.f32 %v2020_v36, %v99_v47 }
  0xf1   :  { %v524_v30 = vadd.f32 %v523_v31, %v464_v58  ;;  %v280_v31 = vld [vmem:[%s2629_s2 + $0x208] sm:$0xff] }
  0xf2   :  { %705 = vmatmul.f32.gmra.mxu0 %v2296_v16  ;;  %823 = vmatmul.f32.gmra.mxu2 %v1841_v57  ;;  %v312_v58 = vld [vmem:[%s2629_s2 + $0x308] sm:$0xff] }
  0xf3   :  { %882 = vmatmul.f32.gmra.mxu3 %v1850_v4  ;;  %1177 = vmatmul.msk.f32.gmra.mxu1 %vm383_vm4, %v2299_v15 }
  0xf4   :  { %913 = vmatpush.msra.mxu0 %v280_v31  ;;  %972 = vmatpush.msra.mxu1 %v312_v58 }
  0xf5   :  { %v582_v57 = vpop.f32.mrf.mxu2 }
  0xf6   :  { %v583_v8 = vadd.f32 %v582_v57, %v524_v30  ;;  %v641_v4 = vpop.f32.mrf.mxu3  ;;  %v105_v30 = vld [vmem:[%s2631_s0 + $0x238] sm:$0xff] }
  0xf7   :  { %v467_v45 = vpop.f32.mrf.mxu0 }
  0xf8   :  { %v2329_v21 = vadd.f32 %v641_v4, %v583_v8  ;;  %v526_v33 = vpop.f32.mrf.mxu1  ;;  %v2349_v4 = vmul.f32 %v2012_v34, %v104_v37  ;;  %v111_v37 = vld [vmem:[%s2631_s0 + $0x268] sm:$0xff] }
  0xf9   :  { %v527_v46 = vadd.f32 %v526_v33, %v467_v45  ;;  %v110_v45 = vld [vmem:[%s2631_s0 + $0x260] sm:$0xff] }
  0xfa   :  { %708 = vmatmul.f32.gmra.mxu0 %v2324_v29  ;;  %826 = vmatmul.f32.gmra.mxu2 %v1878_v20 }
  0xfb   :  { %885 = vmatmul.f32.gmra.mxu3 %v1887_v27  ;;  %1178 = vmatmul.msk.f32.gmra.mxu1 %vm383_vm4, %v2327_v13  ;;  %v2352_v27 = vmul.f32 %v2020_v36, %v105_v30 }
  0xfd   :  { %v585_v47 = vpop.f32.mrf.mxu2  ;;  %2665 = vst [vmem:[#allocation17_spill] sm:$0xff] %v2352_v27 }
  0xfe   :  { %v586_v57 = vadd.f32 %v585_v47, %v527_v46  ;;  %v644_v8 = vpop.f32.mrf.mxu3 }
  0xff   :  { %v470_v20 = vpop.f32.mrf.mxu0 }
 0x100   :  { %v2354_v31 = vadd.f32 %v644_v8, %v586_v57  ;;  %v529_v58 = vpop.f32.mrf.mxu1  ;;  %v2368_v57 = vmul.f32 %v2012_v34, %v110_v45  ;;  %v117_v45 = vld [vmem:[%s2631_s0 + $0x298] sm:$0xff] }
 0x101   :  { %v530_v33 = vadd.f32 %v529_v58, %v470_v20  ;;  %v116_v20 = vld [vmem:[%s2631_s0 + $0x290] sm:$0xff] }
 0x102   :  { %711 = vmatmul.f32.gmra.mxu0 %v2349_v4  ;;  %829 = vmatmul.f32.gmra.mxu2 %v1921_v6 }
 0x103   :  { %888 = vmatmul.f32.gmra.mxu3 %v1930_v17  ;;  %1179 = vmatmul.msk.f32.gmra.mxu1 %vm383_vm4, %v2352_v27  ;;  %v2371_v17 = vmul.f32 %v2020_v36, %v111_v37 }
 0x105   :  { %v588_v46 = vpop.f32.mrf.mxu2  ;;  %2666 = vst [vmem:[#allocation18_spill] sm:$0xff] %v2371_v17 }
 0x106   :  { %v589_v30 = vadd.f32 %v588_v46, %v530_v33  ;;  %v647_v47 = vpop.f32.mrf.mxu3 }
 0x107   :  { %v473_v6 = vpop.f32.mrf.mxu0 }
 0x108   :  { %v2373_v8 = vadd.f32 %v647_v47, %v589_v30  ;;  %v532_v27 = vpop.f32.mrf.mxu1  ;;  %v2387_v30 = vmul.f32 %v2012_v34, %v116_v20 }
 0x109   :  { %v533_v58 = vadd.f32 %v532_v27, %v473_v6 }
 0x10a   :  { %714 = vmatmul.f32.gmra.mxu0 %v2368_v57  ;;  %832 = vmatmul.f32.gmra.mxu2 %v1955_v49 }
 0x10b   :  { %891 = vmatmul.f32.gmra.mxu3 %v1964_v56  ;;  %1180 = vmatmul.msk.f32.gmra.mxu1 %vm383_vm4, %v2371_v17  ;;  %v2390_v56 = vmul.f32 %v2020_v36, %v117_v45 }
 0x10d   :  { %v591_v33 = vpop.f32.mrf.mxu2 }
 0x10e   :  { %v592_v37 = vadd.f32 %v591_v33, %v533_v58  ;;  %v650_v46 = vpop.f32.mrf.mxu3 }
 0x10f   :  { %v476_v49 = vpop.f32.mrf.mxu0 }
 0x110   :  { %v2392_v47 = vadd.f32 %v650_v46, %v592_v37  ;;  %v535_v17 = vpop.f32.mrf.mxu1 }
 0x111   :  { %v536_v27 = vadd.f32 %v535_v17, %v476_v49 }
 0x112   :  { %717 = vmatmul.f32.gmra.mxu0 %v2387_v30  ;;  %835 = vmatmul.f32.gmra.mxu2 %v1992_v5 }
 0x113   :  { %894 = vmatmul.f32.gmra.mxu3 %v2001_v12  ;;  %1181 = vmatmul.msk.f32.gmra.mxu1 %vm383_vm4, %v2390_v56 }
 0x115   :  { %v594_v6 = vpop.f32.mrf.mxu2 }
 0x116   :  { %v595_v34 = vadd.f32 %v594_v6, %v536_v27  ;;  %v653_v20 = vpop.f32.mrf.mxu3 }
 0x117   :  { %v479_v58 = vpop.f32.mrf.mxu0 }
 0x118   :  { %v2399_v33 = vadd.f32 %v653_v20, %v595_v34  ;;  %v538_v36 = vpop.f32.mrf.mxu1 }
 0x119   :  { %v539_v12 = vadd.f32 %v538_v36, %v479_v58 }
 0x11a   :  { %914 = vmatmul.f32.vlgmr.msra.gmra.mxu0 %v1493_v39  ;;  %1032 = vmatmul.f32.vlgmr.msra.gmra.mxu2 %v2029_v18 }
 0x11b   :  { %973 = vmatmul.f32.vlgmr.msra.gmra.mxu1 %v1496_v40  ;;  %1182 = vmatmul.msk.f32.vlgmr.msra.gmra.mxu3 %vm383_vm4, %v2032_v19 }
 0x11d   :  { %v597_v5 = vpop.f32.mrf.mxu2 }
 0x11e   :  { %v598_v45 = vadd.f32 %v597_v5, %v539_v12  ;;  %v656_v17 = vpop.f32.mrf.mxu3 }
 0x11f   :  { %v482_v37 = vpop.f32.mrf.mxu0 }
 0x120   :  { %v2406_v46 = vadd.f32 %v656_v17, %v598_v45  ;;  %v541_v49 = vpop.f32.mrf.mxu1 }
 0x121   :  { %v542_v39 = vadd.f32 %v541_v49, %v482_v37 }
 0x122   :  { %917 = vmatmul.f32.gmra.mxu0 %v1533_v51  ;;  %1035 = vmatmul.f32.gmra.mxu2 %v2058_v38 }
 0x123   :  { %976 = vmatmul.f32.gmra.mxu1 %v1536_v52  ;;  %1183 = vmatmul.msk.f32.gmra.mxu3 %vm383_vm4, %v2061_v41 }
 0x125   :  { %v600_v40 = vpop.f32.mrf.mxu2 }
 0x126   :  { %v601_v18 = vadd.f32 %v600_v40, %v542_v39  ;;  %v659_v19 = vpop.f32.mrf.mxu3 }
 0x127   :  { %v679_v27 = vpop.f32.mrf.mxu0 }
 0x128   :  { %v2413_v6 = vadd.f32 %v659_v19, %v601_v18  ;;  %v680_v34 = vadd.f32 %v679_v27, %v2118_v26  ;;  %v738_v20 = vpop.f32.mrf.mxu1 }
 0x12a   :  { %v739_v58 = vadd.f32 %v738_v20, %v680_v34  ;;  %920 = vmatmul.f32.gmra.mxu0 %v1570_v62  ;;  %1038 = vmatmul.f32.gmra.mxu2 %v2087_v50  ;;  %v2669_v20 = vld [vmem:[#allocation3_spill] sm:$0xff] }
 0x12b   :  { %979 = vmatmul.f32.gmra.mxu1 %v1573_v63  ;;  %1184 = vmatmul.msk.f32.gmra.mxu3 %vm383_vm4, %v2090_v28 }
 0x12c   :  { %1134 = vst [vmem:[%s2632_s3] sm:$0xff] %v739_v58  ;;  %v2671_v58 = vld [vmem:[#allocation16_spill] sm:$0xff] }
 0x12d   :  { %v797_v51 = vpop.f32.mrf.mxu2 }
 0x12e   :  { %v856_v52 = vpop.f32.mrf.mxu3 }
 0x12f   :  { %v2424_v38 = vadd.f32 %v856_v52, %v797_v51  ;;  %v682_v26 = vpop.f32.mrf.mxu0 }
 0x130   :  { %v683_v41 = vadd.f32 %v682_v26, %v2152_v2  ;;  %v741_v36 = vpop.f32.mrf.mxu1 }
 0x132   :  { %v742_v62 = vadd.f32 %v741_v36, %v683_v41  ;;  %923 = vmatmul.f32.gmra.mxu0 %v1607_v9  ;;  %1041 = vmatmul.f32.gmra.mxu2 %v2113_v7 }
 0x133   :  { %982 = vmatmul.f32.gmra.mxu1 %v1610_v10  ;;  %1185 = vmatmul.msk.f32.gmra.mxu3 %vm383_vm4, %v2116_v55 }
 0x134   :  { %1137 = vst [vmem:[%s2632_s3 + $0x10] sm:$0xff] %v742_v62 }
 0x135   :  { %v800_v63 = vpop.f32.mrf.mxu2 }
 0x136   :  { %v859_v50 = vpop.f32.mrf.mxu3 }
 0x137   :  { %v2435_v28 = vadd.f32 %v859_v50, %v800_v63  ;;  %v685_v2 = vpop.f32.mrf.mxu0  ;;  %v2672_v63 = vld [vmem:[#allocation5_spill] sm:$0xff] }
 0x138   :  { %v686_v12 = vadd.f32 %v685_v2, %v2180_v54  ;;  %v744_v5 = vpop.f32.mrf.mxu1 }
 0x13a   :  { %v745_v9 = vadd.f32 %v744_v5, %v686_v12  ;;  %926 = vmatmul.f32.gmra.mxu0 %v1650_v22  ;;  %1044 = vmatmul.f32.gmra.mxu2 %v2147_v53 }
 0x13b   :  { %985 = vmatmul.f32.gmra.mxu1 %v1653_v23  ;;  %1186 = vmatmul.msk.f32.gmra.mxu3 %vm383_vm4, %v2150_v3 }
 0x13c   :  { %1139 = vst [vmem:[%s2632_s3 + $0x20] sm:$0xff] %v745_v9 }
 0x13d   :  { %v803_v10 = vpop.f32.mrf.mxu2 }
 0x13e   :  { %v862_v55 = vpop.f32.mrf.mxu3 }
 0x13f   :  { %v2446_v7 = vadd.f32 %v862_v55, %v803_v10  ;;  %v688_v54 = vpop.f32.mrf.mxu0  ;;  %v2674_v55 = vld [vmem:[#allocation7_spill] sm:$0xff] }
 0x140   :  { %v689_v45 = vadd.f32 %v688_v54, %v2211_v25  ;;  %v747_v17 = vpop.f32.mrf.mxu1 }
 0x142   :  { %v748_v22 = vadd.f32 %v747_v17, %v689_v45  ;;  %929 = vmatmul.f32.gmra.mxu0 %v1687_v42  ;;  %1047 = vmatmul.f32.gmra.mxu2 %v2175_v61 }
 0x143   :  { %988 = vmatmul.f32.gmra.mxu1 %v1690_v43  ;;  %1187 = vmatmul.msk.f32.gmra.mxu3 %vm383_vm4, %v2178_v0 }
 0x144   :  { %1141 = vst [vmem:[%s2632_s3 + $0x30] sm:$0xff] %v748_v22 }
 0x145   :  { %v806_v23 = vpop.f32.mrf.mxu2 }
 0x146   :  { %v865_v3 = vpop.f32.mrf.mxu3 }
 0x147   :  { %v2457_v53 = vadd.f32 %v865_v3, %v806_v23  ;;  %v691_v25 = vpop.f32.mrf.mxu0  ;;  %v2676_v3 = vld [vmem:[#allocation9_spill] sm:$0xff] }
 0x148   :  { %v692_v37 = vadd.f32 %v691_v25, %v2239_v32  ;;  %v750_v49 = vpop.f32.mrf.mxu1 }
 0x14a   :  { %v751_v42 = vadd.f32 %v750_v49, %v692_v37  ;;  %932 = vmatmul.f32.gmra.mxu0 %v1730_v59  ;;  %1050 = vmatmul.f32.gmra.mxu2 %v2206_v24  ;;  %v2668_v24 = vld [vmem:[#allocation15_spill] sm:$0xff] }
 0x14b   :  { %991 = vmatmul.f32.gmra.mxu1 %v1733_v60  ;;  %1188 = vmatmul.msk.f32.gmra.mxu3 %vm383_vm4, %v2209_v35  ;;  %v2667_v60 = vld [vmem:[#allocation2_spill] sm:$0xff] }
 0x14c   :  { %1143 = vst [vmem:[%s2632_s3 + $0x40] sm:$0xff] %v751_v42 }
 0x14d   :  { %v809_v43 = vpop.f32.mrf.mxu2 }
 0x14e   :  { %v868_v61 = vpop.f32.mrf.mxu3 }
 0x14f   :  { %v2468_v0 = vadd.f32 %v868_v61, %v809_v43  ;;  %v694_v32 = vpop.f32.mrf.mxu0 }
 0x150   :  { %v695_v39 = vadd.f32 %v694_v32, %v2270_v11  ;;  %v753_v40 = vpop.f32.mrf.mxu1  ;;  %v2679_v32 = vld [vmem:[#allocation11_spill] sm:$0xff] }
 0x152   :  { %v754_v59 = vadd.f32 %v753_v40, %v695_v39  ;;  %935 = vmatmul.f32.gmra.mxu0 %v1767_v14  ;;  %1053 = vmatmul.f32.gmra.mxu2 %v2234_v44  ;;  %v2670_v44 = vld [vmem:[#allocation4_spill] sm:$0xff]  ;;  %v2681_v39 = vld [vmem:[#allocation18_spill] sm:$0xff] }
 0x153   :  { %994 = vmatmul.f32.gmra.mxu1 %v2667_v60  ;;  %1189 = vmatmul.msk.f32.gmra.mxu3 %vm383_vm4, %v2668_v24 }
 0x154   :  { %1145 = vst [vmem:[%s2632_s3 + $0x50] sm:$0xff] %v754_v59 }
 0x155   :  { %v812_v35 = vpop.f32.mrf.mxu2 }
 0x156   :  { %v871_v18 = vpop.f32.mrf.mxu3 }
 0x157   :  { %v2479_v19 = vadd.f32 %v871_v18, %v812_v35  ;;  %v697_v11 = vpop.f32.mrf.mxu0 }
 0x158   :  { %v698_v27 = vadd.f32 %v697_v11, %v2301_v48  ;;  %v756_v34 = vpop.f32.mrf.mxu1  ;;  %v2682_v11 = vld [vmem:[#allocation13_spill] sm:$0xff] }
 0x15a   :  { %v757_v14 = vadd.f32 %v756_v34, %v698_v27  ;;  %938 = vmatmul.f32.gmra.mxu0 %v2669_v20  ;;  %1056 = vmatmul.f32.gmra.mxu2 %v2265_v1  ;;  %v2673_v1 = vld [vmem:[#allocation6_spill] sm:$0xff] }
 0x15b   :  { %997 = vmatmul.f32.gmra.mxu1 %v2670_v44  ;;  %1190 = vmatmul.msk.f32.gmra.mxu3 %vm383_vm4, %v2671_v58 }
 0x15c   :  { %1147 = vst [vmem:[%s2632_s3 + $0x60] sm:$0xff] %v757_v14 }
 0x15d   :  { %v815_v51 = vpop.f32.mrf.mxu2 }
 0x15e   :  { %v874_v52 = vpop.f32.mrf.mxu3 }
 0x15f   :  { %v2490_v26 = vadd.f32 %v874_v52, %v815_v51  ;;  %v700_v48 = vpop.f32.mrf.mxu0 }
 0x160   :  { %v701_v41 = vadd.f32 %v700_v48, %v2329_v21  ;;  %v759_v36 = vpop.f32.mrf.mxu1 }
 0x162   :  { %v760_v62 = vadd.f32 %v759_v36, %v701_v41  ;;  %941 = vmatmul.f32.gmra.mxu0 %v2672_v63  ;;  %1059 = vmatmul.f32.gmra.mxu2 %v2296_v16  ;;  %v2675_v16 = vld [vmem:[#allocation8_spill] sm:$0xff] }
 0x163   :  { %1000 = vmatmul.f32.gmra.mxu1 %v2673_v1  ;;  %1191 = vmatmul.msk.f32.gmra.mxu3 %vm383_vm4, %v2299_v15 }
 0x164   :  { %1149 = vst [vmem:[%s2632_s3 + $0x70] sm:$0xff] %v760_v62 }
 0x165   :  { %v818_v50 = vpop.f32.mrf.mxu2 }
 0x166   :  { %v877_v2 = vpop.f32.mrf.mxu3 }
 0x167   :  { %v2501_v12 = vadd.f32 %v877_v2, %v818_v50  ;;  %v703_v21 = vpop.f32.mrf.mxu0 }
 0x168   :  { %v704_v5 = vadd.f32 %v703_v21, %v2354_v31  ;;  %v762_v9 = vpop.f32.mrf.mxu1 }
 0x16a   :  { %v763_v10 = vadd.f32 %v762_v9, %v704_v5  ;;  %944 = vmatmul.f32.gmra.mxu0 %v2674_v55  ;;  %1062 = vmatmul.f32.gmra.mxu2 %v2324_v29  ;;  %v2677_v29 = vld [vmem:[#allocation10_spill] sm:$0xff] }
 0x16b   :  { %1003 = vmatmul.f32.gmra.mxu1 %v2675_v16  ;;  %1192 = vmatmul.msk.f32.gmra.mxu3 %vm383_vm4, %v2327_v13  ;;  %v2678_v13 = vld [vmem:[#allocation17_spill] sm:$0xff] }
 0x16c   :  { %1151 = vst [vmem:[%s2632_s3 + $0x80] sm:$0xff] %v763_v10 }
 0x16d   :  { %v821_v15 = vpop.f32.mrf.mxu2 }
 0x16e   :  { %v880_v54 = vpop.f32.mrf.mxu3 }
 0x16f   :  { %v2512_v45 = vadd.f32 %v880_v54, %v821_v15  ;;  %v706_v31 = vpop.f32.mrf.mxu0 }
 0x170   :  { %v707_v17 = vadd.f32 %v706_v31, %v2373_v8  ;;  %v765_v22 = vpop.f32.mrf.mxu1 }
 0x172   :  { %v766_v23 = vadd.f32 %v765_v22, %v707_v17  ;;  %947 = vmatmul.f32.gmra.mxu0 %v2676_v3  ;;  %1065 = vmatmul.f32.gmra.mxu2 %v2349_v4  ;;  %v2680_v4 = vld [vmem:[#allocation12_spill] sm:$0xff] }
 0x173   :  { %1006 = vmatmul.f32.gmra.mxu1 %v2677_v29  ;;  %1193 = vmatmul.msk.f32.gmra.mxu3 %vm383_vm4, %v2678_v13 }
 0x174   :  { %1153 = vst [vmem:[%s2632_s3 + $0x90] sm:$0xff] %v766_v23 }
 0x175   :  { %v824_v25 = vpop.f32.mrf.mxu2 }
 0x176   :  { %v883_v37 = vpop.f32.mrf.mxu3 }
 0x177   :  { %v2523_v49 = vadd.f32 %v883_v37, %v824_v25  ;;  %v709_v8 = vpop.f32.mrf.mxu0 }
 0x178   :  { %v710_v42 = vadd.f32 %v709_v8, %v2392_v47  ;;  %v768_v43 = vpop.f32.mrf.mxu1 }
 0x17a   :  { %v769_v61 = vadd.f32 %v768_v43, %v710_v42  ;;  %950 = vmatmul.f32.gmra.mxu0 %v2679_v32  ;;  %1068 = vmatmul.f32.gmra.mxu2 %v2368_v57  ;;  %v2683_v57 = vld [vmem:[#allocation14_spill] sm:$0xff] }
 0x17b   :  { %1009 = vmatmul.f32.gmra.mxu1 %v2680_v4  ;;  %1194 = vmatmul.msk.f32.gmra.mxu3 %vm383_vm4, %v2681_v39 }
 0x17c   :  { %1155 = vst [vmem:[%s2632_s3 + $0xa0] sm:$0xff] %v769_v61 }
 0x17d   :  { %v827_v40 = vpop.f32.mrf.mxu2 }
 0x17e   :  { %v886_v59 = vpop.f32.mrf.mxu3 }
 0x17f   :  { %v2534_v60 = vadd.f32 %v886_v59, %v827_v40  ;;  %v712_v47 = vpop.f32.mrf.mxu0 }
 0x180   :  { %v713_v24 = vadd.f32 %v712_v47, %v2399_v33  ;;  %v771_v35 = vpop.f32.mrf.mxu1 }
 0x182   :  { %v772_v18 = vadd.f32 %v771_v35, %v713_v24  ;;  %953 = vmatmul.f32.gmra.mxu0 %v2682_v11  ;;  %1071 = vmatmul.f32.gmra.mxu2 %v2387_v30 }
 0x183   :  { %1012 = vmatmul.f32.gmra.mxu1 %v2683_v57  ;;  %1195 = vmatmul.msk.f32.gmra.mxu3 %vm383_vm4, %v2390_v56 }
 0x184   :  { %1157 = vst [vmem:[%s2632_s3 + $0xb0] sm:$0xff] %v772_v18 }
 0x185   :  { %v830_v27 = vpop.f32.mrf.mxu2 }
 0x186   :  { %v889_v34 = vpop.f32.mrf.mxu3 }
 0x187   :  { %v2545_v14 = vadd.f32 %v889_v34, %v830_v27  ;;  %v715_v33 = vpop.f32.mrf.mxu0 }
 0x188   :  { %v716_v20 = vadd.f32 %v715_v33, %v2406_v46  ;;  %v774_v44 = vpop.f32.mrf.mxu1 }
 0x18a   :  { %v775_v58 = vadd.f32 %v774_v44, %v716_v20 }
 0x18c   :  { %1159 = vst [vmem:[%s2632_s3 + $0xc0] sm:$0xff] %v775_v58 }
 0x18d   :  { %v833_v30 = vpop.f32.mrf.mxu2 }
 0x18e   :  { %v892_v51 = vpop.f32.mrf.mxu3 }
 0x18f   :  { %v2551_v56 = vadd.f32 %v892_v51, %v833_v30  ;;  %v718_v52 = vpop.f32.mrf.mxu0 }
 0x190   :  { %v719_v48 = vadd.f32 %v718_v52, %v2413_v6  ;;  %v777_v41 = vpop.f32.mrf.mxu1 }
 0x192   :  { %v778_v36 = vadd.f32 %v777_v41, %v719_v48 }
 0x194   :  { %1161 = vst [vmem:[%s2632_s3 + $0xd0] sm:$0xff] %v778_v36 }
 0x195   :  { %v836_v46 = vpop.f32.mrf.mxu2 }
 0x196   :  { %v895_v62 = vpop.f32.mrf.mxu3 }
 0x197   :  { %v2557_v63 = vadd.f32 %v895_v62, %v836_v46  ;;  %v915_v1 = vpop.f32.mrf.mxu0 }
 0x198   :  { %v916_v50 = vadd.f32 %v915_v1, %v2424_v38  ;;  %v974_v2 = vpop.f32.mrf.mxu1 }
 0x19a   :  { %v975_v21 = vadd.f32 %v974_v2, %v916_v50 }
 0x19d   :  { %v1033_v5 = vpop.f32.mrf.mxu2 }
 0x19e   :  { %v1034_v9 = vadd.f32 %v1033_v5, %v975_v21  ;;  %v1092_v10 = vpop.f32.mrf.mxu3 }
 0x19f   :  { %v918_v55 = vpop.f32.mrf.mxu0 }
 0x1a0   :  { %v919_v6 = vadd.f32 %v918_v55, %v2435_v28  ;;  %v1093_v16 = vadd.f32 %v1092_v10, %v1034_v9  ;;  %v977_v15 = vpop.f32.mrf.mxu1 }
 0x1a2   :  { %1136 = vst.msk [vmem:[%s2632_s3 + $0x8] sm:$0xff] %vm1135_vm5, %v1093_v16  ;;  %v978_v54 = vadd.f32 %v977_v15, %v919_v6 }
 0x1a5   :  { %v1036_v31 = vpop.f32.mrf.mxu2 }
 0x1a6   :  { %v1037_v17 = vadd.f32 %v1036_v31, %v978_v54  ;;  %v1095_v38 = vpop.f32.mrf.mxu3 }
 0x1a7   :  { %v921_v22 = vpop.f32.mrf.mxu0 }
 0x1a8   :  { %v922_v23 = vadd.f32 %v921_v22, %v2446_v7  ;;  %v1096_v3 = vadd.f32 %v1095_v38, %v1037_v17  ;;  %v980_v29 = vpop.f32.mrf.mxu1 }
 0x1aa   :  { %1138 = vst.msk [vmem:[%s2632_s3 + $0x18] sm:$0xff] %vm1135_vm5, %v1096_v3  ;;  %v981_v28 = vadd.f32 %v980_v29, %v922_v23 }
 0x1ad   :  { %v1039_v13 = vpop.f32.mrf.mxu2 }
 0x1ae   :  { %v1040_v25 = vadd.f32 %v1039_v13, %v981_v28  ;;  %v1098_v37 = vpop.f32.mrf.mxu3 }
 0x1af   :  { %v924_v8 = vpop.f32.mrf.mxu0 }
 0x1b0   :  { %v925_v42 = vadd.f32 %v924_v8, %v2457_v53  ;;  %v1099_v43 = vadd.f32 %v1098_v37, %v1040_v25  ;;  %v983_v61 = vpop.f32.mrf.mxu1 }
 0x1b2   :  { %1140 = vst.msk [vmem:[%s2632_s3 + $0x28] sm:$0xff] %vm1135_vm5, %v1099_v43  ;;  %v984_v7 = vadd.f32 %v983_v61, %v925_v42 }
 0x1b5   :  { %v1042_v32 = vpop.f32.mrf.mxu2 }
 0x1b6   :  { %v1043_v4 = vadd.f32 %v1042_v32, %v984_v7  ;;  %v1101_v39 = vpop.f32.mrf.mxu3 }
 0x1b7   :  { %v927_v40 = vpop.f32.mrf.mxu0 }
 0x1b8   :  { %v928_v59 = vadd.f32 %v927_v40, %v2468_v0  ;;  %v1102_v47 = vadd.f32 %v1101_v39, %v1043_v4  ;;  %v986_v24 = vpop.f32.mrf.mxu1 }
 0x1ba   :  { %1142 = vst.msk [vmem:[%s2632_s3 + $0x38] sm:$0xff] %vm1135_vm5, %v1102_v47  ;;  %v987_v53 = vadd.f32 %v986_v24, %v928_v59 }
 0x1bd   :  { %v1045_v35 = vpop.f32.mrf.mxu2 }
 0x1be   :  { %v1046_v18 = vadd.f32 %v1045_v35, %v987_v53  ;;  %v1104_v11 = vpop.f32.mrf.mxu3 }
 0x1bf   :  { %v930_v57 = vpop.f32.mrf.mxu0 }
 0x1c0   :  { %v931_v27 = vadd.f32 %v930_v57, %v2479_v19  ;;  %v1105_v34 = vadd.f32 %v1104_v11, %v1046_v18  ;;  %v989_v33 = vpop.f32.mrf.mxu1 }
 0x1c2   :  { %1144 = vst.msk [vmem:[%s2632_s3 + $0x48] sm:$0xff] %vm1135_vm5, %v1105_v34  ;;  %v990_v0 = vadd.f32 %v989_v33, %v931_v27 }
 0x1c5   :  { %v1048_v20 = vpop.f32.mrf.mxu2 }
 0x1c6   :  { %v1049_v44 = vadd.f32 %v1048_v20, %v990_v0  ;;  %v1107_v58 = vpop.f32.mrf.mxu3 }
 0x1c7   :  { %v933_v30 = vpop.f32.mrf.mxu0 }
 0x1c8   :  { %v934_v51 = vadd.f32 %v933_v30, %v2490_v26  ;;  %v1108_v52 = vadd.f32 %v1107_v58, %v1049_v44  ;;  %v992_v48 = vpop.f32.mrf.mxu1 }
 0x1ca   :  { %1146 = vst.msk [vmem:[%s2632_s3 + $0x58] sm:$0xff] %vm1135_vm5, %v1108_v52  ;;  %v993_v19 = vadd.f32 %v992_v48, %v934_v51 }
 0x1cd   :  { %v1051_v41 = vpop.f32.mrf.mxu2 }
 0x1ce   :  { %v1052_v36 = vadd.f32 %v1051_v41, %v993_v19  ;;  %v1110_v46 = vpop.f32.mrf.mxu3 }
 0x1cf   :  { %v936_v62 = vpop.f32.mrf.mxu0 }
 0x1d0   :  { %v937_v1 = vadd.f32 %v936_v62, %v2501_v12  ;;  %v1111_v50 = vadd.f32 %v1110_v46, %v1052_v36  ;;  %v995_v2 = vpop.f32.mrf.mxu1 }
 0x1d2   :  { %1148 = vst.msk [vmem:[%s2632_s3 + $0x68] sm:$0xff] %vm1135_vm5, %v1111_v50  ;;  %v996_v26 = vadd.f32 %v995_v2, %v937_v1 }
 0x1d5   :  { %v1054_v21 = vpop.f32.mrf.mxu2 }
 0x1d6   :  { %v1055_v5 = vadd.f32 %v1054_v21, %v996_v26  ;;  %v1113_v9 = vpop.f32.mrf.mxu3 }
 0x1d7   :  { %v939_v10 = vpop.f32.mrf.mxu0 }
 0x1d8   :  { %v940_v55 = vadd.f32 %v939_v10, %v2512_v45  ;;  %v1114_v6 = vadd.f32 %v1113_v9, %v1055_v5  ;;  %v998_v16 = vpop.f32.mrf.mxu1 }
 0x1da   :  { %1150 = vst.msk [vmem:[%s2632_s3 + $0x78] sm:$0xff] %vm1135_vm5, %v1114_v6  ;;  %v999_v12 = vadd.f32 %v998_v16, %v940_v55 }
 0x1dd   :  { %v1057_v15 = vpop.f32.mrf.mxu2 }
 0x1de   :  { %v1058_v54 = vadd.f32 %v1057_v15, %v999_v12  ;;  %v1116_v31 = vpop.f32.mrf.mxu3 }
 0x1df   :  { %v942_v17 = vpop.f32.mrf.mxu0 }
 0x1e0   :  { %v943_v38 = vadd.f32 %v942_v17, %v2523_v49  ;;  %v1117_v22 = vadd.f32 %v1116_v31, %v1058_v54  ;;  %v1001_v23 = vpop.f32.mrf.mxu1 }
 0x1e2   :  { %1152 = vst.msk [vmem:[%s2632_s3 + $0x88] sm:$0xff] %vm1135_vm5, %v1117_v22  ;;  %v1002_v45 = vadd.f32 %v1001_v23, %v943_v38 }
 0x1e5   :  { %v1060_v3 = vpop.f32.mrf.mxu2 }
 0x1e6   :  { %v1061_v29 = vadd.f32 %v1060_v3, %v1002_v45  ;;  %v1119_v28 = vpop.f32.mrf.mxu3 }
 0x1e7   :  { %v945_v13 = vpop.f32.mrf.mxu0 }
 0x1e8   :  { %v946_v25 = vadd.f32 %v945_v13, %v2534_v60  ;;  %v1120_v37 = vadd.f32 %v1119_v28, %v1061_v29  ;;  %v1004_v8 = vpop.f32.mrf.mxu1 }
 0x1ea   :  { %1154 = vst.msk [vmem:[%s2632_s3 + $0x98] sm:$0xff] %vm1135_vm5, %v1120_v37  ;;  %v1005_v49 = vadd.f32 %v1004_v8, %v946_v25 }
 0x1ed   :  { %v1063_v42 = vpop.f32.mrf.mxu2 }
 0x1ee   :  { %v1064_v43 = vadd.f32 %v1063_v42, %v1005_v49  ;;  %v1122_v61 = vpop.f32.mrf.mxu3 }
 0x1ef   :  { %v948_v7 = vpop.f32.mrf.mxu0 }
 0x1f0   :  { %v949_v32 = vadd.f32 %v948_v7, %v2545_v14  ;;  %v1123_v4 = vadd.f32 %v1122_v61, %v1064_v43  ;;  %v1007_v39 = vpop.f32.mrf.mxu1 }
 0x1f2   :  { %1156 = vst.msk [vmem:[%s2632_s3 + $0xa8] sm:$0xff] %vm1135_vm5, %v1123_v4  ;;  %v1008_v60 = vadd.f32 %v1007_v39, %v949_v32 }
 0x1f5   :  { %v1066_v40 = vpop.f32.mrf.mxu2 }
 0x1f6   :  { %v1067_v59 = vadd.f32 %v1066_v40, %v1008_v60  ;;  %v1125_v47 = vpop.f32.mrf.mxu3 }
 0x1f7   :  { %v951_v24 = vpop.f32.mrf.mxu0 }
 0x1f8   :  { %v952_v53 = vadd.f32 %v951_v24, %v2551_v56  ;;  %v1126_v35 = vadd.f32 %v1125_v47, %v1067_v59  ;;  %v1010_v18 = vpop.f32.mrf.mxu1 }
 0x1fa   :  { %1158 = vst.msk [vmem:[%s2632_s3 + $0xb8] sm:$0xff] %vm1135_vm5, %v1126_v35  ;;  %v1011_v14 = vadd.f32 %v1010_v18, %v952_v53 }
 0x1fd   :  { %v1069_v11 = vpop.f32.mrf.mxu2 }
 0x1fe   :  { %v1070_v57 = vadd.f32 %v1069_v11, %v1011_v14  ;;  %v1128_v27 = vpop.f32.mrf.mxu3 }
 0x1ff   :  { %v954_v34 = vpop.f32.mrf.mxu0 }
 0x200   :  { %v955_v33 = vadd.f32 %v954_v34, %v2557_v63  ;;  %v1129_v0 = vadd.f32 %v1128_v27, %v1070_v57  ;;  %v1013_v20 = vpop.f32.mrf.mxu1 }
 0x202   :  { %1160 = vst.msk [vmem:[%s2632_s3 + $0xc8] sm:$0xff] %vm1135_vm5, %v1129_v0  ;;  %v1014_v56 = vadd.f32 %v1013_v20, %v955_v33 }
 0x205   :  { %v1072_v44 = vpop.f32.mrf.mxu2 }
 0x206   :  { %v1073_v58 = vadd.f32 %v1072_v44, %v1014_v56  ;;  %v1131_v30 = vpop.f32.mrf.mxu3 }
 0x208   :  { %v1132_v51 = vadd.f32 %v1131_v30, %v1073_v58 }
 0x20a   :  { %1162 = vst.msk [vmem:[%s2632_s3 + $0xd8] sm:$0xff] %vm1135_vm5, %v1132_v51 }

</bundles_post_ra>
